<compile_context>
chip_gen: v5e
topology: v5e:2x2
jax: 0.10.0
libtpu: 0.0.40
codegen_flags: <defaults>
</compile_context>

<pallas_src>
import functools

import jax
import jax.numpy as jnp
from jax.experimental import pallas as pl
from jax.experimental.pallas import tpu as pltpu

_KS = (3, 5, 7, 9)


# --------------------------------------------------------------------------------------
# Pallas kernel
# --------------------------------------------------------------------------------------
def _shifted(src, d, stride, coord, extent, hw):
    """Read src[:, p + d*stride], zero where coord + d falls outside [0, extent).

    src: (rows, HW) f32 value.  coord: (1, HW) int32 per-image column/row index.
    """
    sh = pltpu.roll(src, shift=(-d * stride) % hw, axis=1)
    if d > 0:
        return jnp.where(coord < extent - d, sh, 0.0)
    return jnp.where(coord >= -d, sh, 0.0)


def _tap_pass(src, taps, bias, *, stride, coord, extent, hw, cp, slice_ok, sink):
    """One separable depthwise pass, all 4 ghost groups fused at full c2 width.

    taps: (c2, 9) zero-padded; group g (radius g+1) only has taps at distance a for
    a <= g+1, so distance-a taps touch the channel suffix starting at row (a-1)*cp.
    sink: (ref, row_offset) receiving the (c2, hw) result, or None (value only).
    Returns the (c2, hw) result as an f32 value.
    """
    c2, K = taps.shape
    R = (K - 1) // 2

    # center + distance-1 taps: every group has them -> full width, pure values.
    acc = src * taps[:, R:R + 1] + bias
    acc = acc + _shifted(src, 1, stride, coord, extent, hw) * taps[:, R + 1:R + 2]
    acc = acc + _shifted(src, -1, stride, coord, extent, hw) * taps[:, R - 1:R]

    if not slice_ok:
        # cp not sublane-aligned: keep the original full-width value accumulation
        # (zero-padded taps contribute exactly 0 for the smaller-k groups).
        for a in range(2, R + 1):
            acc = acc + _shifted(src, a, stride, coord, extent, hw) * taps[:, R + a:R + a + 1]
            acc = acc + _shifted(src, -a, stride, coord, extent, hw) * taps[:, R - a:R - a + 1]
        if sink is not None:
            ref, off = sink
            ref[off:off + c2, :] = acc
        return acc

    # cp % 8 == 0: distance-|d|>=2 taps only exist on a tile-aligned channel suffix.
    ref, off = sink
    ref[off:off + c2, :] = acc
    for a in range(2, R + 1):
        lo = (a - 1) * cp                       # first channel row with a distance-a tap
        s = src[lo:, :]
        contrib = (_shifted(s, a, stride, coord, extent, hw) * taps[lo:, R + a:R + a + 1]
                   + _shifted(s, -a, stride, coord, extent, hw) * taps[lo:, R - a:R - a + 1])
        ref[off + lo:off + c2, :] = ref[off + lo:off + c2, :] + contrib
    return ref[off:off + c2, :]


def msl_ghost_attention_kernel(coords_ref, x_ref, w1_ref, w2_ref, wdw_ref, bsm_ref, b2_ref,
                               o_ref, cat_ref, t_ref, *, H, W, cp, slice_ok):
    Bn, C, HW = x_ref.shape
    c2 = C // 2

    # grid-step-invariant parameter reads (hoisted out of the per-image loop)
    w1 = w1_ref[...]                # (c2, C)
    w2 = w2_ref[...]                # (C, C)
    wh = wdw_ref[0]                 # (c2, 9) horizontal taps (zero-padded)
    wv = wdw_ref[1]                 # (c2, 9) vertical taps
    b1 = bsm_ref[0]                 # (c2, 1)
    bh = bsm_ref[1]
    bv = bsm_ref[2]
    b2 = b2_ref[...]                # (C, 1)
    col = coords_ref[0]             # (1, HW) int32: column index of each lane
    row = coords_ref[1]             # (1, HW) int32: row index of each lane

    for b in range(Bn):             # unrolled: amortizes grid-step overhead & weights
        x = x_ref[b]                # (C, HW), native dtype

        # conv1: 1x1 conv == (c2, C) @ (C, HW) MXU matmul
        x0 = jnp.dot(w1, x, preferred_element_type=jnp.float32) + b1
        cat_ref[0:c2, :] = x0       # first half of the conv2 concat (never re-copied)

        # fused horizontal (1xk) depthwise pass over all 4 ghost groups
        t = _tap_pass(x0, wh, bh, stride=1, coord=col, extent=W, hw=HW,
                      cp=cp, slice_ok=slice_ok,
                      sink=(t_ref, 0) if slice_ok else None)

        # fused vertical (kx1) depthwise pass, written straight into concat rows [c2:]
        _tap_pass(t, wv, bv, stride=W, coord=row, extent=H, hw=HW,
                  cp=cp, slice_ok=slice_ok, sink=(cat_ref, c2))

        # conv2 as ONE K=C MXU matmul over the concat scratch, then sigmoid gate
        logits = jnp.dot(w2, cat_ref[...], preferred_element_type=jnp.float32) + b2
        attn = jax.nn.sigmoid(logits)
        o_ref[b] = (x * attn.astype(x.dtype)).astype(o_ref.dtype)


# --------------------------------------------------------------------------------------
# Wrapper: pack PyTorch-style parameters and launch the kernel
# --------------------------------------------------------------------------------------
def _pack_params(params, C):
    """Pack PyTorch-shaped parameters into 5 fused-layout arrays (fewer DMA descriptors)."""
    c2, cp = C // 2, C // 8
    K = max(_KS)
    R = (K - 1) // 2

    w1 = params["conv1_w"].reshape(c2, C).astype(jnp.float32)
    w2 = params["conv2_w"].reshape(C, C).astype(jnp.float32)      # (Cout, Cin), unsplit
    b2 = params["conv2_b"].reshape(C, 1).astype(jnp.float32)

    wdw = jnp.zeros((2, c2, K), jnp.float32)                      # [0]=horizontal, [1]=vertical
    bsm = jnp.zeros((3, c2, 1), jnp.float32)                      # [0]=b1, [1]=bh, [2]=bv
    bsm = bsm.at[0, :, 0].set(params["conv1_b"].reshape(c2))
    for g, k in enumerate(_KS):
        r = (k - 1) // 2
        rows = slice(g * cp, (g + 1) * cp)
        wdw = wdw.at[0, rows, R - r:R + r + 1].set(params["dw_h_w"][g].reshape(cp, k))
        wdw = wdw.at[1, rows, R - r:R + r + 1].set(params["dw_v_w"][g].reshape(cp, k))
        bsm = bsm.at[1, rows, 0].set(params["dw_h_b"][g])
        bsm = bsm.at[2, rows, 0].set(params["dw_v_b"][g])
    return w1, w2, wdw, bsm, b2


def _pick_bn(N, C, HW, dtype_bytes, vmem_budget=8 * 2 ** 20):
    """Largest divisor of N whose double-buffered in+out blocks fit a modest VMEM budget."""
    per_img = 4 * C * HW * dtype_bytes          # (in + out) x double-buffer
    cap = max(1, int(vmem_budget // max(per_img, 1)))
    for cand in range(min(N, cap), 0, -1):
        if N % cand == 0:
            return cand
    return 1


def msl_ghost_attention(x_nchw, params, *, bn=None):
    N, C, H, W = x_nchw.shape
    assert C % 16 == 0, "MSLGhostAttention kernel: channels must be divisible by 16"
    HW = H * W
    assert HW % 128 == 0, "H*W must be a multiple of 128 for lane-dense tiles"
    c2, cp = C // 2, C // 8
    slice_ok = (cp % 8 == 0)                    # tap-suffix slicing needs tile-aligned cp

    x3 = x_nchw.reshape(N, C, HW)               # free reshape (contiguous), no transpose
    w1, w2, wdw, bsm, b2 = _pack_params(params, C)

    # per-image lane coordinates, precomputed (no int div/mod on the VPU in-kernel)
    col = jnp.tile(jnp.arange(W, dtype=jnp.int32), H)
    row = jnp.repeat(jnp.arange(H, dtype=jnp.int32), W)
    coords = jnp.stack([col, row], axis=0).reshape(2, 1, HW)

    dtype_bytes = x_nchw.dtype.itemsize
    if bn is None:
        bn = _pick_bn(N, C, HW, dtype_bytes)

    def full(a):                                # grid-invariant whole-array block
        return pl.BlockSpec(a.shape, lambda b: (0,) * a.ndim)

    in_specs = [full(coords),
                pl.BlockSpec((bn, C, HW), lambda b: (b, 0, 0)),
                full(w1), full(w2), full(wdw), full(bsm), full(b2)]

    kern = functools.partial(msl_ghost_attention_kernel, H=H, W=W, cp=cp, slice_ok=slice_ok)

    # rough cost hint for XLA's scheduler
    flops = int(N * HW * (2 * c2 * C + 2 * C * C + 4 * cp * sum(2 * k for k in _KS) + C))
    cost = pl.CostEstimate(flops=flops,
                           transcendentals=int(N * C * HW),
                           bytes_accessed=int(2 * N * C * HW * dtype_bytes))

    # VMEM plan: double-buffered in/out blocks + f32 scratches + packed weights, with headroom
    block_bytes = bn * C * HW * dtype_bytes
    scratch_bytes = (C + c2) * HW * 4
    weight_bytes = sum(a.size * a.dtype.itemsize for a in (w1, w2, wdw, bsm, b2, coords))
    vmem_limit = int(min(100 * 2 ** 20,
                         max(32 * 2 ** 20, 2 * (4 * block_bytes + scratch_bytes + weight_bytes))))

    out3 = pl.pallas_call(
        kern,
        out_shape=jax.ShapeDtypeStruct((N, C, HW), x_nchw.dtype),
        grid=(N // bn,),
        in_specs=in_specs,
        out_specs=pl.BlockSpec((bn, C, HW), lambda b: (b, 0, 0)),
        scratch_shapes=[pltpu.VMEM((C, HW), jnp.float32),    # conv2 concat [x0 ; y]
                        pltpu.VMEM((c2, HW), jnp.float32)],  # horizontal-pass intermediate
        compiler_params=pltpu.CompilerParams(
            dimension_semantics=("parallel",),
            vmem_limit_bytes=vmem_limit),
        cost_estimate=cost,
    )(coords, x3, w1, w2, wdw, bsm, b2)

    return out3.reshape(N, C, H, W)


# --------------------------------------------------------------------------------------
# Parameters (PyTorch nn.Module parameterization) and pure-JAX reference
# --------------------------------------------------------------------------------------
def init_params(key, C):
    """Deterministic synthetic parameters matching the nn.Module's own shapes."""
    c2, cp = C // 2, C // 8
    keys = iter(jax.random.split(key, 4 + 4 * len(_KS)))
    rnd = lambda k, shape: 0.1 * jax.random.normal(k, shape, jnp.float32)
    params = {
        "conv1_w": rnd(next(keys), (c2, C)),    # Conv2d(C, c2, 1)   (OI)
        "conv1_b": rnd(next(keys), (c2,)),
        "conv2_w": rnd(next(keys), (C, C)),     # Conv2d(C, C, 1)    (OI)
        "conv2_b": rnd(next(keys), (C,)),
        "dw_h_w": [], "dw_h_b": [], "dw_v_w": [], "dw_v_b": [],
    }
    for k_sz in _KS:
        params["dw_h_w"].append(rnd(next(keys), (cp, k_sz)))   # (1, k) depthwise taps
        params["dw_h_b"].append(rnd(next(keys), (cp,)))
        params["dw_v_w"].append(rnd(next(keys), (cp, k_sz)))   # (k, 1) depthwise taps
        params["dw_v_b"].append(rnd(next(keys), (cp,)))
    return params


def ref_forward(x, params):
    """Pure-JAX NCHW reference matching the PyTorch module exactly."""
    C = x.shape[1]
    cp = C // 8

    def conv1x1(inp, w, b):
        y = jax.lax.conv_general_dilated(
            inp, w[:, :, None, None], (1, 1), ((0, 0), (0, 0)),
            dimension_numbers=("NCHW", "OIHW", "NCHW"))
        return y + b.reshape(1, -1, 1, 1)

    def dwconv(inp, w_oihw, b, pad):
        y = jax.lax.conv_general_dilated(
            inp, w_oihw, (1, 1), pad,
            dimension_numbers=("NCHW", "OIHW", "NCHW"), feature_group_count=cp)
        return y + b.reshape(1, -1, 1, 1)

    x0 = conv1x1(x, params["conv1_w"], params["conv1_b"])
    ys = []
    for g, k in enumerate(_KS):
        r = (k - 1) // 2
        xg = x0[:, g * cp:(g + 1) * cp]
        t = dwconv(xg, params["dw_h_w"][g].reshape(cp, 1, 1, k),
                   params["dw_h_b"][g], ((0, 0), (r, r)))
        yv = dwconv(t, params["dw_v_w"][g].reshape(cp, 1, k, 1),
                    params["dw_v_b"][g], ((r, r), (0, 0)))
        ys.append(yv)
    cat = jnp.concatenate([x0] + ys, axis=1)
    attn = jax.nn.sigmoid(conv1x1(cat, params["conv2_w"], params["conv2_b"]))
    return x * attn


# --------------------------------------------------------------------------------------
if __name__ == "__main__":
    key = jax.random.PRNGKey(0)

    # (N, C, H, W) test cases: the second one has cp % 8 == 0 and exercises the
    # tap-suffix sliced path; the first exercises the full-width fallback + Bn batching.
    cases = [(2, 16, 16, 16), (1, 64, 16, 16)]
    for (N, C, H, W) in cases:
        kx, kp, key = jax.random.split(key, 3)
        x = jax.random.normal(kx, (N, C, H, W), jnp.float32)
        params = init_params(kp, C)

        out = jax.block_until_ready(msl_ghost_attention(x, params))
        ref = ref_forward(x, params)

        assert out.shape == ref.shape == (N, C, H, W)
        max_err = float(jnp.max(jnp.abs(out - ref)))
        assert jnp.allclose(out, ref, atol=3e-4, rtol=3e-4), (N, C, H, W, max_err)

    print("KERNEL_OK")
</pallas_src>

<mosaic_0001>
module attributes {stable_mosaic.version = 11 : i64} {
  func.func @msl_ghost_attention_kernel(%arg0: i32, %arg1: memref<2x1x256xi32, #tpu.memory_space<vmem>>, %arg2: memref<2x16x256xf32, #tpu.memory_space<vmem>>, %arg3: memref<8x16xf32, #tpu.memory_space<vmem>>, %arg4: memref<16x16xf32, #tpu.memory_space<vmem>>, %arg5: memref<2x8x9xf32, #tpu.memory_space<vmem>>, %arg6: memref<3x8x1xf32, #tpu.memory_space<vmem>>, %arg7: memref<16x1xf32, #tpu.memory_space<vmem>>, %arg8: memref<2x16x256xf32, #tpu.memory_space<vmem>>, %arg9: memref<16x256xf32, #tpu.memory_space<vmem>>, %arg10: memref<8x256xf32, #tpu.memory_space<vmem>>) attributes {dimension_semantics = [#tpu.dimension_semantics<parallel>], iteration_bounds = array<i64: 1>, scalar_prefetch = 0 : i64, scratch_operands = 2 : i64, tpu.core_type = #tpu.core_type<tc>, window_params = [{pipeline_mode = #tpu.pipeline_mode<synchronous>, transform_indices = @transform_0, window_bounds = array<i64: 2, 1, 256>}, {transform_indices = @transform_1, window_bounds = array<i64: 2, 16, 256>}, {pipeline_mode = #tpu.pipeline_mode<synchronous>, transform_indices = @transform_2, window_bounds = array<i64: 8, 16>}, {pipeline_mode = #tpu.pipeline_mode<synchronous>, transform_indices = @transform_3, window_bounds = array<i64: 16, 16>}, {pipeline_mode = #tpu.pipeline_mode<synchronous>, transform_indices = @transform_4, window_bounds = array<i64: 2, 8, 9>}, {pipeline_mode = #tpu.pipeline_mode<synchronous>, transform_indices = @transform_5, window_bounds = array<i64: 3, 8, 1>}, {pipeline_mode = #tpu.pipeline_mode<synchronous>, transform_indices = @transform_6, window_bounds = array<i64: 16, 1>}, {transform_indices = @transform_7, window_bounds = array<i64: 2, 16, 256>}]} {
    %c0 = arith.constant 0 : index
    %c0_0 = arith.constant 0 : index
    %0 = vector.load %arg3[%c0, %c0_0] : memref<8x16xf32, #tpu.memory_space<vmem>>, vector<8x16xf32>
    %c0_1 = arith.constant 0 : index
    %c0_2 = arith.constant 0 : index
    %1 = vector.load %arg4[%c0_1, %c0_2] : memref<16x16xf32, #tpu.memory_space<vmem>>, vector<16x16xf32>
    %c0_3 = arith.constant 0 : index
    %c0_4 = arith.constant 0 : index
    %c0_5 = arith.constant 0 : index
    %2 = vector.load %arg5[%c0_3, %c0_4, %c0_5] : memref<2x8x9xf32, #tpu.memory_space<vmem>>, vector<1x8x9xf32>
    %3 = vector.shape_cast %2 : vector<1x8x9xf32> to vector<8x9xf32>
    %c1 = arith.constant 1 : index
    %c0_6 = arith.constant 0 : index
    %c0_7 = arith.constant 0 : index
    %4 = vector.load %arg5[%c1, %c0_6, %c0_7] : memref<2x8x9xf32, #tpu.memory_space<vmem>>, vector<1x8x9xf32>
    %5 = vector.shape_cast %4 : vector<1x8x9xf32> to vector<8x9xf32>
    %c0_8 = arith.constant 0 : index
    %c0_9 = arith.constant 0 : index
    %c0_10 = arith.constant 0 : index
    %6 = vector.load %arg6[%c0_8, %c0_9, %c0_10] : memref<3x8x1xf32, #tpu.memory_space<vmem>>, vector<1x8x1xf32>
    %7 = vector.shape_cast %6 : vector<1x8x1xf32> to vector<8x1xf32>
    %c1_11 = arith.constant 1 : index
    %c0_12 = arith.constant 0 : index
    %c0_13 = arith.constant 0 : index
    %8 = vector.load %arg6[%c1_11, %c0_12, %c0_13] : memref<3x8x1xf32, #tpu.memory_space<vmem>>, vector<1x8x1xf32>
    %9 = vector.shape_cast %8 : vector<1x8x1xf32> to vector<8x1xf32>
    %c2 = arith.constant 2 : index
    %c0_14 = arith.constant 0 : index
    %c0_15 = arith.constant 0 : index
    %10 = vector.load %arg6[%c2, %c0_14, %c0_15] : memref<3x8x1xf32, #tpu.memory_space<vmem>>, vector<1x8x1xf32>
    %11 = vector.shape_cast %10 : vector<1x8x1xf32> to vector<8x1xf32>
    %c0_16 = arith.constant 0 : index
    %c0_17 = arith.constant 0 : index
    %12 = vector.load %arg7[%c0_16, %c0_17] : memref<16x1xf32, #tpu.memory_space<vmem>>, vector<16x1xf32>
    %c0_18 = arith.constant 0 : index
    %c0_19 = arith.constant 0 : index
    %c0_20 = arith.constant 0 : index
    %13 = vector.load %arg1[%c0_18, %c0_19, %c0_20] : memref<2x1x256xi32, #tpu.memory_space<vmem>>, vector<1x1x256xi32>
    %14 = vector.shape_cast %13 : vector<1x1x256xi32> to vector<1x256xi32>
    %c1_21 = arith.constant 1 : index
    %c0_22 = arith.constant 0 : index
    %c0_23 = arith.constant 0 : index
    %15 = vector.load %arg1[%c1_21, %c0_22, %c0_23] : memref<2x1x256xi32, #tpu.memory_space<vmem>>, vector<1x1x256xi32>
    %16 = vector.shape_cast %15 : vector<1x1x256xi32> to vector<1x256xi32>
    %c0_24 = arith.constant 0 : index
    %c0_25 = arith.constant 0 : index
    %c0_26 = arith.constant 0 : index
    %17 = vector.load %arg2[%c0_24, %c0_25, %c0_26] : memref<2x16x256xf32, #tpu.memory_space<vmem>>, vector<1x16x256xf32>
    %18 = vector.shape_cast %17 : vector<1x16x256xf32> to vector<16x256xf32>
    %cst = arith.constant dense<0.000000e+00> : vector<8x256xf32>
    %19 = tpu.matmul %0, %18, %cst {dimension_numbers = #tpu.dot_dimension_numbers<[1], [0], [0], [1], [0, 0, 1, 1], [], []>} : vector<8x16xf32>, vector<16x256xf32>, vector<8x256xf32> -> vector<8x256xf32>
    %20 = vector.broadcast %7 : vector<8x1xf32> to vector<8x256xf32>
    %21 = arith.addf %19, %20 : vector<8x256xf32>
    %c0_27 = arith.constant 0 : index
    %c0_28 = arith.constant 0 : index
    %22 = vector.load %arg9[%c0_27, %c0_28] : memref<16x256xf32, #tpu.memory_space<vmem>>, vector<8x256xf32>
    tpu.vector_store %arg9[%c0_27, %c0_28], %21 {strides = array<i32>} : memref<16x256xf32, #tpu.memory_space<vmem>>, vector<8x256xf32>,
    %23 = vector.extract_strided_slice %3 {offsets = [0, 4], sizes = [8, 1], strides = [1, 1]} : vector<8x9xf32> to vector<8x1xf32>
    %24 = vector.broadcast %23 : vector<8x1xf32> to vector<8x256xf32>
    %25 = arith.mulf %21, %24 : vector<8x256xf32>
    %26 = vector.broadcast %9 : vector<8x1xf32> to vector<8x256xf32>
    %27 = arith.addf %25, %26 : vector<8x256xf32>
    %c255_i32 = arith.constant 255 : i32
    %28 = tpu.dynamic_rotate %21 by %c255_i32 dim 1 : vector<8x256xf32>, i32 -> vector<8x256xf32>
    %c15_i32 = arith.constant 15 : i32
    %29 = vector.broadcast %c15_i32 : i32 to vector<1x256xi32>
    %30 = arith.cmpi slt, %14, %29 : vector<1x256xi32>
    %cst_29 = arith.constant 0.000000e+00 : f32
    %31 = vector.shape_cast %30 : vector<1x256xi1> to vector<1x256xi1>
    %32 = vector.broadcast %31 : vector<1x256xi1> to vector<8x256xi1>
    %33 = vector.broadcast %cst_29 : f32 to vector<8x256xf32>
    %34 = arith.select %32, %28, %33 : vector<8x256xi1>, vector<8x256xf32>
    %35 = vector.extract_strided_slice %3 {offsets = [0, 5], sizes = [8, 1], strides = [1, 1]} : vector<8x9xf32> to vector<8x1xf32>
    %36 = vector.broadcast %35 : vector<8x1xf32> to vector<8x256xf32>
    %37 = arith.mulf %34, %36 : vector<8x256xf32>
    %38 = arith.addf %27, %37 : vector<8x256xf32>
    %c1_i32 = arith.constant 1 : i32
    %39 = tpu.dynamic_rotate %21 by %c1_i32 dim 1 : vector<8x256xf32>, i32 -> vector<8x256xf32>
    %c1_i32_30 = arith.constant 1 : i32
    %40 = vector.broadcast %c1_i32_30 : i32 to vector<1x256xi32>
    %41 = arith.cmpi sge, %14, %40 : vector<1x256xi32>
    %cst_31 = arith.constant 0.000000e+00 : f32
    %42 = vector.shape_cast %41 : vector<1x256xi1> to vector<1x256xi1>
    %43 = vector.broadcast %42 : vector<1x256xi1> to vector<8x256xi1>
    %44 = vector.broadcast %cst_31 : f32 to vector<8x256xf32>
    %45 = arith.select %43, %39, %44 : vector<8x256xi1>, vector<8x256xf32>
    %46 = vector.extract_strided_slice %3 {offsets = [0, 3], sizes = [8, 1], strides = [1, 1]} : vector<8x9xf32> to vector<8x1xf32>
    %47 = vector.broadcast %46 : vector<8x1xf32> to vector<8x256xf32>
    %48 = arith.mulf %45, %47 : vector<8x256xf32>
    %49 = arith.addf %38, %48 : vector<8x256xf32>
    %c254_i32 = arith.constant 254 : i32
    %50 = tpu.dynamic_rotate %21 by %c254_i32 dim 1 : vector<8x256xf32>, i32 -> vector<8x256xf32>
    %c14_i32 = arith.constant 14 : i32
    %51 = vector.broadcast %c14_i32 : i32 to vector<1x256xi32>
    %52 = arith.cmpi slt, %14, %51 : vector<1x256xi32>
    %cst_32 = arith.constant 0.000000e+00 : f32
    %53 = vector.shape_cast %52 : vector<1x256xi1> to vector<1x256xi1>
    %54 = vector.broadcast %53 : vector<1x256xi1> to vector<8x256xi1>
    %55 = vector.broadcast %cst_32 : f32 to vector<8x256xf32>
    %56 = arith.select %54, %50, %55 : vector<8x256xi1>, vector<8x256xf32>
    %57 = vector.extract_strided_slice %3 {offsets = [0, 6], sizes = [8, 1], strides = [1, 1]} : vector<8x9xf32> to vector<8x1xf32>
    %58 = vector.broadcast %57 : vector<8x1xf32> to vector<8x256xf32>
    %59 = arith.mulf %56, %58 : vector<8x256xf32>
    %60 = arith.addf %49, %59 : vector<8x256xf32>
    %c2_i32 = arith.constant 2 : i32
    %61 = tpu.dynamic_rotate %21 by %c2_i32 dim 1 : vector<8x256xf32>, i32 -> vector<8x256xf32>
    %c2_i32_33 = arith.constant 2 : i32
    %62 = vector.broadcast %c2_i32_33 : i32 to vector<1x256xi32>
    %63 = arith.cmpi sge, %14, %62 : vector<1x256xi32>
    %cst_34 = arith.constant 0.000000e+00 : f32
    %64 = vector.shape_cast %63 : vector<1x256xi1> to vector<1x256xi1>
    %65 = vector.broadcast %64 : vector<1x256xi1> to vector<8x256xi1>
    %66 = vector.broadcast %cst_34 : f32 to vector<8x256xf32>
    %67 = arith.select %65, %61, %66 : vector<8x256xi1>, vector<8x256xf32>
    %68 = vector.extract_strided_slice %3 {offsets = [0, 2], sizes = [8, 1], strides = [1, 1]} : vector<8x9xf32> to vector<8x1xf32>
    %69 = vector.broadcast %68 : vector<8x1xf32> to vector<8x256xf32>
    %70 = arith.mulf %67, %69 : vector<8x256xf32>
    %71 = arith.addf %60, %70 : vector<8x256xf32>
    %c253_i32 = arith.constant 253 : i32
    %72 = tpu.dynamic_rotate %21 by %c253_i32 dim 1 : vector<8x256xf32>, i32 -> vector<8x256xf32>
    %c13_i32 = arith.constant 13 : i32
    %73 = vector.broadcast %c13_i32 : i32 to vector<1x256xi32>
    %74 = arith.cmpi slt, %14, %73 : vector<1x256xi32>
    %cst_35 = arith.constant 0.000000e+00 : f32
    %75 = vector.shape_cast %74 : vector<1x256xi1> to vector<1x256xi1>
    %76 = vector.broadcast %75 : vector<1x256xi1> to vector<8x256xi1>
    %77 = vector.broadcast %cst_35 : f32 to vector<8x256xf32>
    %78 = arith.select %76, %72, %77 : vector<8x256xi1>, vector<8x256xf32>
    %79 = vector.extract_strided_slice %3 {offsets = [0, 7], sizes = [8, 1], strides = [1, 1]} : vector<8x9xf32> to vector<8x1xf32>
    %80 = vector.broadcast %79 : vector<8x1xf32> to vector<8x256xf32>
    %81 = arith.mulf %78, %80 : vector<8x256xf32>
    %82 = arith.addf %71, %81 : vector<8x256xf32>
    %c3_i32 = arith.constant 3 : i32
    %83 = tpu.dynamic_rotate %21 by %c3_i32 dim 1 : vector<8x256xf32>, i32 -> vector<8x256xf32>
    %c3_i32_36 = arith.constant 3 : i32
    %84 = vector.broadcast %c3_i32_36 : i32 to vector<1x256xi32>
    %85 = arith.cmpi sge, %14, %84 : vector<1x256xi32>
    %cst_37 = arith.constant 0.000000e+00 : f32
    %86 = vector.shape_cast %85 : vector<1x256xi1> to vector<1x256xi1>
    %87 = vector.broadcast %86 : vector<1x256xi1> to vector<8x256xi1>
    %88 = vector.broadcast %cst_37 : f32 to vector<8x256xf32>
    %89 = arith.select %87, %83, %88 : vector<8x256xi1>, vector<8x256xf32>
    %90 = vector.extract_strided_slice %3 {offsets = [0, 1], sizes = [8, 1], strides = [1, 1]} : vector<8x9xf32> to vector<8x1xf32>
    %91 = vector.broadcast %90 : vector<8x1xf32> to vector<8x256xf32>
    %92 = arith.mulf %89, %91 : vector<8x256xf32>
    %93 = arith.addf %82, %92 : vector<8x256xf32>
    %c252_i32 = arith.constant 252 : i32
    %94 = tpu.dynamic_rotate %21 by %c252_i32 dim 1 : vector<8x256xf32>, i32 -> vector<8x256xf32>
    %c12_i32 = arith.constant 12 : i32
    %95 = vector.broadcast %c12_i32 : i32 to vector<1x256xi32>
    %96 = arith.cmpi slt, %14, %95 : vector<1x256xi32>
    %cst_38 = arith.constant 0.000000e+00 : f32
    %97 = vector.shape_cast %96 : vector<1x256xi1> to vector<1x256xi1>
    %98 = vector.broadcast %97 : vector<1x256xi1> to vector<8x256xi1>
    %99 = vector.broadcast %cst_38 : f32 to vector<8x256xf32>
    %100 = arith.select %98, %94, %99 : vector<8x256xi1>, vector<8x256xf32>
    %101 = vector.extract_strided_slice %3 {offsets = [0, 8], sizes = [8, 1], strides = [1, 1]} : vector<8x9xf32> to vector<8x1xf32>
    %102 = vector.broadcast %101 : vector<8x1xf32> to vector<8x256xf32>
    %103 = arith.mulf %100, %102 : vector<8x256xf32>
    %104 = arith.addf %93, %103 : vector<8x256xf32>
    %c4_i32 = arith.constant 4 : i32
    %105 = tpu.dynamic_rotate %21 by %c4_i32 dim 1 : vector<8x256xf32>, i32 -> vector<8x256xf32>
    %c4_i32_39 = arith.constant 4 : i32
    %106 = vector.broadcast %c4_i32_39 : i32 to vector<1x256xi32>
    %107 = arith.cmpi sge, %14, %106 : vector<1x256xi32>
    %cst_40 = arith.constant 0.000000e+00 : f32
    %108 = vector.shape_cast %107 : vector<1x256xi1> to vector<1x256xi1>
    %109 = vector.broadcast %108 : vector<1x256xi1> to vector<8x256xi1>
    %110 = vector.broadcast %cst_40 : f32 to vector<8x256xf32>
    %111 = arith.select %109, %105, %110 : vector<8x256xi1>, vector<8x256xf32>
    %112 = vector.extract_strided_slice %3 {offsets = [0, 0], sizes = [8, 1], strides = [1, 1]} : vector<8x9xf32> to vector<8x1xf32>
    %113 = vector.broadcast %112 : vector<8x1xf32> to vector<8x256xf32>
    %114 = arith.mulf %111, %113 : vector<8x256xf32>
    %115 = arith.addf %104, %114 : vector<8x256xf32>
    %116 = vector.extract_strided_slice %5 {offsets = [0, 4], sizes = [8, 1], strides = [1, 1]} : vector<8x9xf32> to vector<8x1xf32>
    %117 = vector.broadcast %116 : vector<8x1xf32> to vector<8x256xf32>
    %118 = arith.mulf %115, %117 : vector<8x256xf32>
    %119 = vector.broadcast %11 : vector<8x1xf32> to vector<8x256xf32>
    %120 = arith.addf %118, %119 : vector<8x256xf32>
    %c240_i32 = arith.constant 240 : i32
    %121 = tpu.dynamic_rotate %115 by %c240_i32 dim 1 : vector<8x256xf32>, i32 -> vector<8x256xf32>
    %c15_i32_41 = arith.constant 15 : i32
    %122 = vector.broadcast %c15_i32_41 : i32 to vector<1x256xi32>
    %123 = arith.cmpi slt, %16, %122 : vector<1x256xi32>
    %cst_42 = arith.constant 0.000000e+00 : f32
    %124 = vector.shape_cast %123 : vector<1x256xi1> to vector<1x256xi1>
    %125 = vector.broadcast %124 : vector<1x256xi1> to vector<8x256xi1>
    %126 = vector.broadcast %cst_42 : f32 to vector<8x256xf32>
    %127 = arith.select %125, %121, %126 : vector<8x256xi1>, vector<8x256xf32>
    %128 = vector.extract_strided_slice %5 {offsets = [0, 5], sizes = [8, 1], strides = [1, 1]} : vector<8x9xf32> to vector<8x1xf32>
    %129 = vector.broadcast %128 : vector<8x1xf32> to vector<8x256xf32>
    %130 = arith.mulf %127, %129 : vector<8x256xf32>
    %131 = arith.addf %120, %130 : vector<8x256xf32>
    %c16_i32 = arith.constant 16 : i32
    %132 = tpu.dynamic_rotate %115 by %c16_i32 dim 1 : vector<8x256xf32>, i32 -> vector<8x256xf32>
    %c1_i32_43 = arith.constant 1 : i32
    %133 = vector.broadcast %c1_i32_43 : i32 to vector<1x256xi32>
    %134 = arith.cmpi sge, %16, %133 : vector<1x256xi32>
    %cst_44 = arith.constant 0.000000e+00 : f32
    %135 = vector.shape_cast %134 : vector<1x256xi1> to vector<1x256xi1>
    %136 = vector.broadcast %135 : vector<1x256xi1> to vector<8x256xi1>
    %137 = vector.broadcast %cst_44 : f32 to vector<8x256xf32>
    %138 = arith.select %136, %132, %137 : vector<8x256xi1>, vector<8x256xf32>
    %139 = vector.extract_strided_slice %5 {offsets = [0, 3], sizes = [8, 1], strides = [1, 1]} : vector<8x9xf32> to vector<8x1xf32>
    %140 = vector.broadcast %139 : vector<8x1xf32> to vector<8x256xf32>
    %141 = arith.mulf %138, %140 : vector<8x256xf32>
    %142 = arith.addf %131, %141 : vector<8x256xf32>
    %c224_i32 = arith.constant 224 : i32
    %143 = tpu.dynamic_rotate %115 by %c224_i32 dim 1 : vector<8x256xf32>, i32 -> vector<8x256xf32>
    %c14_i32_45 = arith.constant 14 : i32
    %144 = vector.broadcast %c14_i32_45 : i32 to vector<1x256xi32>
    %145 = arith.cmpi slt, %16, %144 : vector<1x256xi32>
    %cst_46 = arith.constant 0.000000e+00 : f32
    %146 = vector.shape_cast %145 : vector<1x256xi1> to vector<1x256xi1>
    %147 = vector.broadcast %146 : vector<1x256xi1> to vector<8x256xi1>
    %148 = vector.broadcast %cst_46 : f32 to vector<8x256xf32>
    %149 = arith.select %147, %143, %148 : vector<8x256xi1>, vector<8x256xf32>
    %150 = vector.extract_strided_slice %5 {offsets = [0, 6], sizes = [8, 1], strides = [1, 1]} : vector<8x9xf32> to vector<8x1xf32>
    %151 = vector.broadcast %150 : vector<8x1xf32> to vector<8x256xf32>
    %152 = arith.mulf %149, %151 : vector<8x256xf32>
    %153 = arith.addf %142, %152 : vector<8x256xf32>
    %c32_i32 = arith.constant 32 : i32
    %154 = tpu.dynamic_rotate %115 by %c32_i32 dim 1 : vector<8x256xf32>, i32 -> vector<8x256xf32>
    %c2_i32_47 = arith.constant 2 : i32
    %155 = vector.broadcast %c2_i32_47 : i32 to vector<1x256xi32>
    %156 = arith.cmpi sge, %16, %155 : vector<1x256xi32>
    %cst_48 = arith.constant 0.000000e+00 : f32
    %157 = vector.shape_cast %156 : vector<1x256xi1> to vector<1x256xi1>
    %158 = vector.broadcast %157 : vector<1x256xi1> to vector<8x256xi1>
    %159 = vector.broadcast %cst_48 : f32 to vector<8x256xf32>
    %160 = arith.select %158, %154, %159 : vector<8x256xi1>, vector<8x256xf32>
    %161 = vector.extract_strided_slice %5 {offsets = [0, 2], sizes = [8, 1], strides = [1, 1]} : vector<8x9xf32> to vector<8x1xf32>
    %162 = vector.broadcast %161 : vector<8x1xf32> to vector<8x256xf32>
    %163 = arith.mulf %160, %162 : vector<8x256xf32>
    %164 = arith.addf %153, %163 : vector<8x256xf32>
    %c208_i32 = arith.constant 208 : i32
    %165 = tpu.dynamic_rotate %115 by %c208_i32 dim 1 : vector<8x256xf32>, i32 -> vector<8x256xf32>
    %c13_i32_49 = arith.constant 13 : i32
    %166 = vector.broadcast %c13_i32_49 : i32 to vector<1x256xi32>
    %167 = arith.cmpi slt, %16, %166 : vector<1x256xi32>
    %cst_50 = arith.constant 0.000000e+00 : f32
    %168 = vector.shape_cast %167 : vector<1x256xi1> to vector<1x256xi1>
    %169 = vector.broadcast %168 : vector<1x256xi1> to vector<8x256xi1>
    %170 = vector.broadcast %cst_50 : f32 to vector<8x256xf32>
    %171 = arith.select %169, %165, %170 : vector<8x256xi1>, vector<8x256xf32>
    %172 = vector.extract_strided_slice %5 {offsets = [0, 7], sizes = [8, 1], strides = [1, 1]} : vector<8x9xf32> to vector<8x1xf32>
    %173 = vector.broadcast %172 : vector<8x1xf32> to vector<8x256xf32>
    %174 = arith.mulf %171, %173 : vector<8x256xf32>
    %175 = arith.addf %164, %174 : vector<8x256xf32>
    %c48_i32 = arith.constant 48 : i32
    %176 = tpu.dynamic_rotate %115 by %c48_i32 dim 1 : vector<8x256xf32>, i32 -> vector<8x256xf32>
    %c3_i32_51 = arith.constant 3 : i32
    %177 = vector.broadcast %c3_i32_51 : i32 to vector<1x256xi32>
    %178 = arith.cmpi sge, %16, %177 : vector<1x256xi32>
    %cst_52 = arith.constant 0.000000e+00 : f32
    %179 = vector.shape_cast %178 : vector<1x256xi1> to vector<1x256xi1>
    %180 = vector.broadcast %179 : vector<1x256xi1> to vector<8x256xi1>
    %181 = vector.broadcast %cst_52 : f32 to vector<8x256xf32>
    %182 = arith.select %180, %176, %181 : vector<8x256xi1>, vector<8x256xf32>
    %183 = vector.extract_strided_slice %5 {offsets = [0, 1], sizes = [8, 1], strides = [1, 1]} : vector<8x9xf32> to vector<8x1xf32>
    %184 = vector.broadcast %183 : vector<8x1xf32> to vector<8x256xf32>
    %185 = arith.mulf %182, %184 : vector<8x256xf32>
    %186 = arith.addf %175, %185 : vector<8x256xf32>
    %c192_i32 = arith.constant 192 : i32
    %187 = tpu.dynamic_rotate %115 by %c192_i32 dim 1 : vector<8x256xf32>, i32 -> vector<8x256xf32>
    %c12_i32_53 = arith.constant 12 : i32
    %188 = vector.broadcast %c12_i32_53 : i32 to vector<1x256xi32>
    %189 = arith.cmpi slt, %16, %188 : vector<1x256xi32>
    %cst_54 = arith.constant 0.000000e+00 : f32
    %190 = vector.shape_cast %189 : vector<1x256xi1> to vector<1x256xi1>
    %191 = vector.broadcast %190 : vector<1x256xi1> to vector<8x256xi1>
    %192 = vector.broadcast %cst_54 : f32 to vector<8x256xf32>
    %193 = arith.select %191, %187, %192 : vector<8x256xi1>, vector<8x256xf32>
    %194 = vector.extract_strided_slice %5 {offsets = [0, 8], sizes = [8, 1], strides = [1, 1]} : vector<8x9xf32> to vector<8x1xf32>
    %195 = vector.broadcast %194 : vector<8x1xf32> to vector<8x256xf32>
    %196 = arith.mulf %193, %195 : vector<8x256xf32>
    %197 = arith.addf %186, %196 : vector<8x256xf32>
    %c64_i32 = arith.constant 64 : i32
    %198 = tpu.dynamic_rotate %115 by %c64_i32 dim 1 : vector<8x256xf32>, i32 -> vector<8x256xf32>
    %c4_i32_55 = arith.constant 4 : i32
    %199 = vector.broadcast %c4_i32_55 : i32 to vector<1x256xi32>
    %200 = arith.cmpi sge, %16, %199 : vector<1x256xi32>
    %cst_56 = arith.constant 0.000000e+00 : f32
    %201 = vector.shape_cast %200 : vector<1x256xi1> to vector<1x256xi1>
    %202 = vector.broadcast %201 : vector<1x256xi1> to vector<8x256xi1>
    %203 = vector.broadcast %cst_56 : f32 to vector<8x256xf32>
    %204 = arith.select %202, %198, %203 : vector<8x256xi1>, vector<8x256xf32>
    %205 = vector.extract_strided_slice %5 {offsets = [0, 0], sizes = [8, 1], strides = [1, 1]} : vector<8x9xf32> to vector<8x1xf32>
    %206 = vector.broadcast %205 : vector<8x1xf32> to vector<8x256xf32>
    %207 = arith.mulf %204, %206 : vector<8x256xf32>
    %208 = arith.addf %197, %207 : vector<8x256xf32>
    %c8 = arith.constant 8 : index
    %c0_57 = arith.constant 0 : index
    %209 = vector.load %arg9[%c8, %c0_57] : memref<16x256xf32, #tpu.memory_space<vmem>>, vector<8x256xf32>
    tpu.vector_store %arg9[%c8, %c0_57], %208 {strides = array<i32>} : memref<16x256xf32, #tpu.memory_space<vmem>>, vector<8x256xf32>,
    %c0_58 = arith.constant 0 : index
    %c0_59 = arith.constant 0 : index
    %210 = vector.load %arg9[%c0_58, %c0_59] : memref<16x256xf32, #tpu.memory_space<vmem>>, vector<16x256xf32>
    %cst_60 = arith.constant dense<0.000000e+00> : vector<16x256xf32>
    %211 = tpu.matmul %1, %210, %cst_60 {dimension_numbers = #tpu.dot_dimension_numbers<[1], [0], [0], [1], [0, 0, 1, 1], [], []>} : vector<16x16xf32>, vector<16x256xf32>, vector<16x256xf32> -> vector<16x256xf32>
    %212 = vector.broadcast %12 : vector<16x1xf32> to vector<16x256xf32>
    %213 = arith.addf %211, %212 : vector<16x256xf32>
    %214 = arith.negf %213 : vector<16x256xf32>
    %215 = math.exp %214 : vector<16x256xf32>
    %cst_61 = arith.constant 1.000000e+00 : f32
    %216 = vector.broadcast %cst_61 : f32 to vector<16x256xf32>
    %217 = arith.addf %216, %215 : vector<16x256xf32>
    %218 = arith.divf %216, %217 : vector<16x256xf32>
    %219 = arith.mulf %18, %218 : vector<16x256xf32>
    %c0_62 = arith.constant 0 : index
    %c0_63 = arith.constant 0 : index
    %c0_64 = arith.constant 0 : index
    %220 = vector.load %arg8[%c0_62, %c0_63, %c0_64] : memref<2x16x256xf32, #tpu.memory_space<vmem>>, vector<1x16x256xf32>
    %221 = vector.shape_cast %220 : vector<1x16x256xf32> to vector<16x256xf32>
    %222 = vector.shape_cast %219 : vector<16x256xf32> to vector<1x16x256xf32>
    tpu.vector_store %arg8[%c0_62, %c0_63, %c0_64], %222 {strides = array<i32>} : memref<2x16x256xf32, #tpu.memory_space<vmem>>, vector<1x16x256xf32>,
    %c1_65 = arith.constant 1 : index
    %c0_66 = arith.constant 0 : index
    %c0_67 = arith.constant 0 : index
    %223 = vector.load %arg2[%c1_65, %c0_66, %c0_67] : memref<2x16x256xf32, #tpu.memory_space<vmem>>, vector<1x16x256xf32>
    %224 = vector.shape_cast %223 : vector<1x16x256xf32> to vector<16x256xf32>
    %cst_68 = arith.constant dense<0.000000e+00> : vector<8x256xf32>
    %225 = tpu.matmul %0, %224, %cst_68 {dimension_numbers = #tpu.dot_dimension_numbers<[1], [0], [0], [1], [0, 0, 1, 1], [], []>} : vector<8x16xf32>, vector<16x256xf32>, vector<8x256xf32> -> vector<8x256xf32>
    %226 = vector.broadcast %7 : vector<8x1xf32> to vector<8x256xf32>
    %227 = arith.addf %225, %226 : vector<8x256xf32>
    %c0_69 = arith.constant 0 : index
    %c0_70 = arith.constant 0 : index
    %228 = vector.load %arg9[%c0_69, %c0_70] : memref<16x256xf32, #tpu.memory_space<vmem>>, vector<8x256xf32>
    tpu.vector_store %arg9[%c0_69, %c0_70], %227 {strides = array<i32>} : memref<16x256xf32, #tpu.memory_space<vmem>>, vector<8x256xf32>,
    %229 = vector.extract_strided_slice %3 {offsets = [0, 4], sizes = [8, 1], strides = [1, 1]} : vector<8x9xf32> to vector<8x1xf32>
    %230 = vector.broadcast %229 : vector<8x1xf32> to vector<8x256xf32>
    %231 = arith.mulf %227, %230 : vector<8x256xf32>
    %232 = vector.broadcast %9 : vector<8x1xf32> to vector<8x256xf32>
    %233 = arith.addf %231, %232 : vector<8x256xf32>
    %c255_i32_71 = arith.constant 255 : i32
    %234 = tpu.dynamic_rotate %227 by %c255_i32_71 dim 1 : vector<8x256xf32>, i32 -> vector<8x256xf32>
    %c15_i32_72 = arith.constant 15 : i32
    %235 = vector.broadcast %c15_i32_72 : i32 to vector<1x256xi32>
    %236 = arith.cmpi slt, %14, %235 : vector<1x256xi32>
    %cst_73 = arith.constant 0.000000e+00 : f32
    %237 = vector.shape_cast %236 : vector<1x256xi1> to vector<1x256xi1>
    %238 = vector.broadcast %237 : vector<1x256xi1> to vector<8x256xi1>
    %239 = vector.broadcast %cst_73 : f32 to vector<8x256xf32>
    %240 = arith.select %238, %234, %239 : vector<8x256xi1>, vector<8x256xf32>
    %241 = vector.extract_strided_slice %3 {offsets = [0, 5], sizes = [8, 1], strides = [1, 1]} : vector<8x9xf32> to vector<8x1xf32>
    %242 = vector.broadcast %241 : vector<8x1xf32> to vector<8x256xf32>
    %243 = arith.mulf %240, %242 : vector<8x256xf32>
    %244 = arith.addf %233, %243 : vector<8x256xf32>
    %c1_i32_74 = arith.constant 1 : i32
    %245 = tpu.dynamic_rotate %227 by %c1_i32_74 dim 1 : vector<8x256xf32>, i32 -> vector<8x256xf32>
    %c1_i32_75 = arith.constant 1 : i32
    %246 = vector.broadcast %c1_i32_75 : i32 to vector<1x256xi32>
    %247 = arith.cmpi sge, %14, %246 : vector<1x256xi32>
    %cst_76 = arith.constant 0.000000e+00 : f32
    %248 = vector.shape_cast %247 : vector<1x256xi1> to vector<1x256xi1>
    %249 = vector.broadcast %248 : vector<1x256xi1> to vector<8x256xi1>
    %250 = vector.broadcast %cst_76 : f32 to vector<8x256xf32>
    %251 = arith.select %249, %245, %250 : vector<8x256xi1>, vector<8x256xf32>
    %252 = vector.extract_strided_slice %3 {offsets = [0, 3], sizes = [8, 1], strides = [1, 1]} : vector<8x9xf32> to vector<8x1xf32>
    %253 = vector.broadcast %252 : vector<8x1xf32> to vector<8x256xf32>
    %254 = arith.mulf %251, %253 : vector<8x256xf32>
    %255 = arith.addf %244, %254 : vector<8x256xf32>
    %c254_i32_77 = arith.constant 254 : i32
    %256 = tpu.dynamic_rotate %227 by %c254_i32_77 dim 1 : vector<8x256xf32>, i32 -> vector<8x256xf32>
    %c14_i32_78 = arith.constant 14 : i32
    %257 = vector.broadcast %c14_i32_78 : i32 to vector<1x256xi32>
    %258 = arith.cmpi slt, %14, %257 : vector<1x256xi32>
    %cst_79 = arith.constant 0.000000e+00 : f32
    %259 = vector.shape_cast %258 : vector<1x256xi1> to vector<1x256xi1>
    %260 = vector.broadcast %259 : vector<1x256xi1> to vector<8x256xi1>
    %261 = vector.broadcast %cst_79 : f32 to vector<8x256xf32>
    %262 = arith.select %260, %256, %261 : vector<8x256xi1>, vector<8x256xf32>
    %263 = vector.extract_strided_slice %3 {offsets = [0, 6], sizes = [8, 1], strides = [1, 1]} : vector<8x9xf32> to vector<8x1xf32>
    %264 = vector.broadcast %263 : vector<8x1xf32> to vector<8x256xf32>
    %265 = arith.mulf %262, %264 : vector<8x256xf32>
    %266 = arith.addf %255, %265 : vector<8x256xf32>
    %c2_i32_80 = arith.constant 2 : i32
    %267 = tpu.dynamic_rotate %227 by %c2_i32_80 dim 1 : vector<8x256xf32>, i32 -> vector<8x256xf32>
    %c2_i32_81 = arith.constant 2 : i32
    %268 = vector.broadcast %c2_i32_81 : i32 to vector<1x256xi32>
    %269 = arith.cmpi sge, %14, %268 : vector<1x256xi32>
    %cst_82 = arith.constant 0.000000e+00 : f32
    %270 = vector.shape_cast %269 : vector<1x256xi1> to vector<1x256xi1>
    %271 = vector.broadcast %270 : vector<1x256xi1> to vector<8x256xi1>
    %272 = vector.broadcast %cst_82 : f32 to vector<8x256xf32>
    %273 = arith.select %271, %267, %272 : vector<8x256xi1>, vector<8x256xf32>
    %274 = vector.extract_strided_slice %3 {offsets = [0, 2], sizes = [8, 1], strides = [1, 1]} : vector<8x9xf32> to vector<8x1xf32>
    %275 = vector.broadcast %274 : vector<8x1xf32> to vector<8x256xf32>
    %276 = arith.mulf %273, %275 : vector<8x256xf32>
    %277 = arith.addf %266, %276 : vector<8x256xf32>
    %c253_i32_83 = arith.constant 253 : i32
    %278 = tpu.dynamic_rotate %227 by %c253_i32_83 dim 1 : vector<8x256xf32>, i32 -> vector<8x256xf32>
    %c13_i32_84 = arith.constant 13 : i32
    %279 = vector.broadcast %c13_i32_84 : i32 to vector<1x256xi32>
    %280 = arith.cmpi slt, %14, %279 : vector<1x256xi32>
    %cst_85 = arith.constant 0.000000e+00 : f32
    %281 = vector.shape_cast %280 : vector<1x256xi1> to vector<1x256xi1>
    %282 = vector.broadcast %281 : vector<1x256xi1> to vector<8x256xi1>
    %283 = vector.broadcast %cst_85 : f32 to vector<8x256xf32>
    %284 = arith.select %282, %278, %283 : vector<8x256xi1>, vector<8x256xf32>
    %285 = vector.extract_strided_slice %3 {offsets = [0, 7], sizes = [8, 1], strides = [1, 1]} : vector<8x9xf32> to vector<8x1xf32>
    %286 = vector.broadcast %285 : vector<8x1xf32> to vector<8x256xf32>
    %287 = arith.mulf %284, %286 : vector<8x256xf32>
    %288 = arith.addf %277, %287 : vector<8x256xf32>
    %c3_i32_86 = arith.constant 3 : i32
    %289 = tpu.dynamic_rotate %227 by %c3_i32_86 dim 1 : vector<8x256xf32>, i32 -> vector<8x256xf32>
    %c3_i32_87 = arith.constant 3 : i32
    %290 = vector.broadcast %c3_i32_87 : i32 to vector<1x256xi32>
    %291 = arith.cmpi sge, %14, %290 : vector<1x256xi32>
    %cst_88 = arith.constant 0.000000e+00 : f32
    %292 = vector.shape_cast %291 : vector<1x256xi1> to vector<1x256xi1>
    %293 = vector.broadcast %292 : vector<1x256xi1> to vector<8x256xi1>
    %294 = vector.broadcast %cst_88 : f32 to vector<8x256xf32>
    %295 = arith.select %293, %289, %294 : vector<8x256xi1>, vector<8x256xf32>
    %296 = vector.extract_strided_slice %3 {offsets = [0, 1], sizes = [8, 1], strides = [1, 1]} : vector<8x9xf32> to vector<8x1xf32>
    %297 = vector.broadcast %296 : vector<8x1xf32> to vector<8x256xf32>
    %298 = arith.mulf %295, %297 : vector<8x256xf32>
    %299 = arith.addf %288, %298 : vector<8x256xf32>
    %c252_i32_89 = arith.constant 252 : i32
    %300 = tpu.dynamic_rotate %227 by %c252_i32_89 dim 1 : vector<8x256xf32>, i32 -> vector<8x256xf32>
    %c12_i32_90 = arith.constant 12 : i32
    %301 = vector.broadcast %c12_i32_90 : i32 to vector<1x256xi32>
    %302 = arith.cmpi slt, %14, %301 : vector<1x256xi32>
    %cst_91 = arith.constant 0.000000e+00 : f32
    %303 = vector.shape_cast %302 : vector<1x256xi1> to vector<1x256xi1>
    %304 = vector.broadcast %303 : vector<1x256xi1> to vector<8x256xi1>
    %305 = vector.broadcast %cst_91 : f32 to vector<8x256xf32>
    %306 = arith.select %304, %300, %305 : vector<8x256xi1>, vector<8x256xf32>
    %307 = vector.extract_strided_slice %3 {offsets = [0, 8], sizes = [8, 1], strides = [1, 1]} : vector<8x9xf32> to vector<8x1xf32>
    %308 = vector.broadcast %307 : vector<8x1xf32> to vector<8x256xf32>
    %309 = arith.mulf %306, %308 : vector<8x256xf32>
    %310 = arith.addf %299, %309 : vector<8x256xf32>
    %c4_i32_92 = arith.constant 4 : i32
    %311 = tpu.dynamic_rotate %227 by %c4_i32_92 dim 1 : vector<8x256xf32>, i32 -> vector<8x256xf32>
    %c4_i32_93 = arith.constant 4 : i32
    %312 = vector.broadcast %c4_i32_93 : i32 to vector<1x256xi32>
    %313 = arith.cmpi sge, %14, %312 : vector<1x256xi32>
    %cst_94 = arith.constant 0.000000e+00 : f32
    %314 = vector.shape_cast %313 : vector<1x256xi1> to vector<1x256xi1>
    %315 = vector.broadcast %314 : vector<1x256xi1> to vector<8x256xi1>
    %316 = vector.broadcast %cst_94 : f32 to vector<8x256xf32>
    %317 = arith.select %315, %311, %316 : vector<8x256xi1>, vector<8x256xf32>
    %318 = vector.extract_strided_slice %3 {offsets = [0, 0], sizes = [8, 1], strides = [1, 1]} : vector<8x9xf32> to vector<8x1xf32>
    %319 = vector.broadcast %318 : vector<8x1xf32> to vector<8x256xf32>
    %320 = arith.mulf %317, %319 : vector<8x256xf32>
    %321 = arith.addf %310, %320 : vector<8x256xf32>
    %322 = vector.extract_strided_slice %5 {offsets = [0, 4], sizes = [8, 1], strides = [1, 1]} : vector<8x9xf32> to vector<8x1xf32>
    %323 = vector.broadcast %322 : vector<8x1xf32> to vector<8x256xf32>
    %324 = arith.mulf %321, %323 : vector<8x256xf32>
    %325 = vector.broadcast %11 : vector<8x1xf32> to vector<8x256xf32>
    %326 = arith.addf %324, %325 : vector<8x256xf32>
    %c240_i32_95 = arith.constant 240 : i32
    %327 = tpu.dynamic_rotate %321 by %c240_i32_95 dim 1 : vector<8x256xf32>, i32 -> vector<8x256xf32>
    %c15_i32_96 = arith.constant 15 : i32
    %328 = vector.broadcast %c15_i32_96 : i32 to vector<1x256xi32>
    %329 = arith.cmpi slt, %16, %328 : vector<1x256xi32>
    %cst_97 = arith.constant 0.000000e+00 : f32
    %330 = vector.shape_cast %329 : vector<1x256xi1> to vector<1x256xi1>
    %331 = vector.broadcast %330 : vector<1x256xi1> to vector<8x256xi1>
    %332 = vector.broadcast %cst_97 : f32 to vector<8x256xf32>
    %333 = arith.select %331, %327, %332 : vector<8x256xi1>, vector<8x256xf32>
    %334 = vector.extract_strided_slice %5 {offsets = [0, 5], sizes = [8, 1], strides = [1, 1]} : vector<8x9xf32> to vector<8x1xf32>
    %335 = vector.broadcast %334 : vector<8x1xf32> to vector<8x256xf32>
    %336 = arith.mulf %333, %335 : vector<8x256xf32>
    %337 = arith.addf %326, %336 : vector<8x256xf32>
    %c16_i32_98 = arith.constant 16 : i32
    %338 = tpu.dynamic_rotate %321 by %c16_i32_98 dim 1 : vector<8x256xf32>, i32 -> vector<8x256xf32>
    %c1_i32_99 = arith.constant 1 : i32
    %339 = vector.broadcast %c1_i32_99 : i32 to vector<1x256xi32>
    %340 = arith.cmpi sge, %16, %339 : vector<1x256xi32>
    %cst_100 = arith.constant 0.000000e+00 : f32
    %341 = vector.shape_cast %340 : vector<1x256xi1> to vector<1x256xi1>
    %342 = vector.broadcast %341 : vector<1x256xi1> to vector<8x256xi1>
    %343 = vector.broadcast %cst_100 : f32 to vector<8x256xf32>
    %344 = arith.select %342, %338, %343 : vector<8x256xi1>, vector<8x256xf32>
    %345 = vector.extract_strided_slice %5 {offsets = [0, 3], sizes = [8, 1], strides = [1, 1]} : vector<8x9xf32> to vector<8x1xf32>
    %346 = vector.broadcast %345 : vector<8x1xf32> to vector<8x256xf32>
    %347 = arith.mulf %344, %346 : vector<8x256xf32>
    %348 = arith.addf %337, %347 : vector<8x256xf32>
    %c224_i32_101 = arith.constant 224 : i32
    %349 = tpu.dynamic_rotate %321 by %c224_i32_101 dim 1 : vector<8x256xf32>, i32 -> vector<8x256xf32>
    %c14_i32_102 = arith.constant 14 : i32
    %350 = vector.broadcast %c14_i32_102 : i32 to vector<1x256xi32>
    %351 = arith.cmpi slt, %16, %350 : vector<1x256xi32>
    %cst_103 = arith.constant 0.000000e+00 : f32
    %352 = vector.shape_cast %351 : vector<1x256xi1> to vector<1x256xi1>
    %353 = vector.broadcast %352 : vector<1x256xi1> to vector<8x256xi1>
    %354 = vector.broadcast %cst_103 : f32 to vector<8x256xf32>
    %355 = arith.select %353, %349, %354 : vector<8x256xi1>, vector<8x256xf32>
    %356 = vector.extract_strided_slice %5 {offsets = [0, 6], sizes = [8, 1], strides = [1, 1]} : vector<8x9xf32> to vector<8x1xf32>
    %357 = vector.broadcast %356 : vector<8x1xf32> to vector<8x256xf32>
    %358 = arith.mulf %355, %357 : vector<8x256xf32>
    %359 = arith.addf %348, %358 : vector<8x256xf32>
    %c32_i32_104 = arith.constant 32 : i32
    %360 = tpu.dynamic_rotate %321 by %c32_i32_104 dim 1 : vector<8x256xf32>, i32 -> vector<8x256xf32>
    %c2_i32_105 = arith.constant 2 : i32
    %361 = vector.broadcast %c2_i32_105 : i32 to vector<1x256xi32>
    %362 = arith.cmpi sge, %16, %361 : vector<1x256xi32>
    %cst_106 = arith.constant 0.000000e+00 : f32
    %363 = vector.shape_cast %362 : vector<1x256xi1> to vector<1x256xi1>
    %364 = vector.broadcast %363 : vector<1x256xi1> to vector<8x256xi1>
    %365 = vector.broadcast %cst_106 : f32 to vector<8x256xf32>
    %366 = arith.select %364, %360, %365 : vector<8x256xi1>, vector<8x256xf32>
    %367 = vector.extract_strided_slice %5 {offsets = [0, 2], sizes = [8, 1], strides = [1, 1]} : vector<8x9xf32> to vector<8x1xf32>
    %368 = vector.broadcast %367 : vector<8x1xf32> to vector<8x256xf32>
    %369 = arith.mulf %366, %368 : vector<8x256xf32>
    %370 = arith.addf %359, %369 : vector<8x256xf32>
    %c208_i32_107 = arith.constant 208 : i32
    %371 = tpu.dynamic_rotate %321 by %c208_i32_107 dim 1 : vector<8x256xf32>, i32 -> vector<8x256xf32>
    %c13_i32_108 = arith.constant 13 : i32
    %372 = vector.broadcast %c13_i32_108 : i32 to vector<1x256xi32>
    %373 = arith.cmpi slt, %16, %372 : vector<1x256xi32>
    %cst_109 = arith.constant 0.000000e+00 : f32
    %374 = vector.shape_cast %373 : vector<1x256xi1> to vector<1x256xi1>
    %375 = vector.broadcast %374 : vector<1x256xi1> to vector<8x256xi1>
    %376 = vector.broadcast %cst_109 : f32 to vector<8x256xf32>
    %377 = arith.select %375, %371, %376 : vector<8x256xi1>, vector<8x256xf32>
    %378 = vector.extract_strided_slice %5 {offsets = [0, 7], sizes = [8, 1], strides = [1, 1]} : vector<8x9xf32> to vector<8x1xf32>
    %379 = vector.broadcast %378 : vector<8x1xf32> to vector<8x256xf32>
    %380 = arith.mulf %377, %379 : vector<8x256xf32>
    %381 = arith.addf %370, %380 : vector<8x256xf32>
    %c48_i32_110 = arith.constant 48 : i32
    %382 = tpu.dynamic_rotate %321 by %c48_i32_110 dim 1 : vector<8x256xf32>, i32 -> vector<8x256xf32>
    %c3_i32_111 = arith.constant 3 : i32
    %383 = vector.broadcast %c3_i32_111 : i32 to vector<1x256xi32>
    %384 = arith.cmpi sge, %16, %383 : vector<1x256xi32>
    %cst_112 = arith.constant 0.000000e+00 : f32
    %385 = vector.shape_cast %384 : vector<1x256xi1> to vector<1x256xi1>
    %386 = vector.broadcast %385 : vector<1x256xi1> to vector<8x256xi1>
    %387 = vector.broadcast %cst_112 : f32 to vector<8x256xf32>
    %388 = arith.select %386, %382, %387 : vector<8x256xi1>, vector<8x256xf32>
    %389 = vector.extract_strided_slice %5 {offsets = [0, 1], sizes = [8, 1], strides = [1, 1]} : vector<8x9xf32> to vector<8x1xf32>
    %390 = vector.broadcast %389 : vector<8x1xf32> to vector<8x256xf32>
    %391 = arith.mulf %388, %390 : vector<8x256xf32>
    %392 = arith.addf %381, %391 : vector<8x256xf32>
    %c192_i32_113 = arith.constant 192 : i32
    %393 = tpu.dynamic_rotate %321 by %c192_i32_113 dim 1 : vector<8x256xf32>, i32 -> vector<8x256xf32>
    %c12_i32_114 = arith.constant 12 : i32
    %394 = vector.broadcast %c12_i32_114 : i32 to vector<1x256xi32>
    %395 = arith.cmpi slt, %16, %394 : vector<1x256xi32>
    %cst_115 = arith.constant 0.000000e+00 : f32
    %396 = vector.shape_cast %395 : vector<1x256xi1> to vector<1x256xi1>
    %397 = vector.broadcast %396 : vector<1x256xi1> to vector<8x256xi1>
    %398 = vector.broadcast %cst_115 : f32 to vector<8x256xf32>
    %399 = arith.select %397, %393, %398 : vector<8x256xi1>, vector<8x256xf32>
    %400 = vector.extract_strided_slice %5 {offsets = [0, 8], sizes = [8, 1], strides = [1, 1]} : vector<8x9xf32> to vector<8x1xf32>
    %401 = vector.broadcast %400 : vector<8x1xf32> to vector<8x256xf32>
    %402 = arith.mulf %399, %401 : vector<8x256xf32>
    %403 = arith.addf %392, %402 : vector<8x256xf32>
    %c64_i32_116 = arith.constant 64 : i32
    %404 = tpu.dynamic_rotate %321 by %c64_i32_116 dim 1 : vector<8x256xf32>, i32 -> vector<8x256xf32>
    %c4_i32_117 = arith.constant 4 : i32
    %405 = vector.broadcast %c4_i32_117 : i32 to vector<1x256xi32>
    %406 = arith.cmpi sge, %16, %405 : vector<1x256xi32>
    %cst_118 = arith.constant 0.000000e+00 : f32
    %407 = vector.shape_cast %406 : vector<1x256xi1> to vector<1x256xi1>
    %408 = vector.broadcast %407 : vector<1x256xi1> to vector<8x256xi1>
    %409 = vector.broadcast %cst_118 : f32 to vector<8x256xf32>
    %410 = arith.select %408, %404, %409 : vector<8x256xi1>, vector<8x256xf32>
    %411 = vector.extract_strided_slice %5 {offsets = [0, 0], sizes = [8, 1], strides = [1, 1]} : vector<8x9xf32> to vector<8x1xf32>
    %412 = vector.broadcast %411 : vector<8x1xf32> to vector<8x256xf32>
    %413 = arith.mulf %410, %412 : vector<8x256xf32>
    %414 = arith.addf %403, %413 : vector<8x256xf32>
    %c8_119 = arith.constant 8 : index
    %c0_120 = arith.constant 0 : index
    %415 = vector.load %arg9[%c8_119, %c0_120] : memref<16x256xf32, #tpu.memory_space<vmem>>, vector<8x256xf32>
    tpu.vector_store %arg9[%c8_119, %c0_120], %414 {strides = array<i32>} : memref<16x256xf32, #tpu.memory_space<vmem>>, vector<8x256xf32>,
    %c0_121 = arith.constant 0 : index
    %c0_122 = arith.constant 0 : index
    %416 = vector.load %arg9[%c0_121, %c0_122] : memref<16x256xf32, #tpu.memory_space<vmem>>, vector<16x256xf32>
    %cst_123 = arith.constant dense<0.000000e+00> : vector<16x256xf32>
    %417 = tpu.matmul %1, %416, %cst_123 {dimension_numbers = #tpu.dot_dimension_numbers<[1], [0], [0], [1], [0, 0, 1, 1], [], []>} : vector<16x16xf32>, vector<16x256xf32>, vector<16x256xf32> -> vector<16x256xf32>
    %418 = vector.broadcast %12 : vector<16x1xf32> to vector<16x256xf32>
    %419 = arith.addf %417, %418 : vector<16x256xf32>
    %420 = arith.negf %419 : vector<16x256xf32>
    %421 = math.exp %420 : vector<16x256xf32>
    %cst_124 = arith.constant 1.000000e+00 : f32
    %422 = vector.broadcast %cst_124 : f32 to vector<16x256xf32>
    %423 = arith.addf %422, %421 : vector<16x256xf32>
    %424 = arith.divf %422, %423 : vector<16x256xf32>
    %425 = arith.mulf %224, %424 : vector<16x256xf32>
    %c1_125 = arith.constant 1 : index
    %c0_126 = arith.constant 0 : index
    %c0_127 = arith.constant 0 : index
    %426 = vector.load %arg8[%c1_125, %c0_126, %c0_127] : memref<2x16x256xf32, #tpu.memory_space<vmem>>, vector<1x16x256xf32>
    %427 = vector.shape_cast %426 : vector<1x16x256xf32> to vector<16x256xf32>
    %428 = vector.shape_cast %425 : vector<16x256xf32> to vector<1x16x256xf32>
    tpu.vector_store %arg8[%c1_125, %c0_126, %c0_127], %428 {strides = array<i32>} : memref<2x16x256xf32, #tpu.memory_space<vmem>>, vector<1x16x256xf32>,
    return
  }
  func.func @transform_0(%arg0: i32) -> (i32, i32, i32) {
    %c0_i32 = arith.constant 0 : i32
    %c0_i32_0 = arith.constant 0 : i32
    %c0_i32_1 = arith.constant 0 : i32
    %c0_i32_2 = arith.constant 0 : i32
    return %c0_i32, %c0_i32_0, %c0_i32_1 : i32, i32, i32
  }
  func.func @transform_1(%arg0: i32) -> (i32, i32, i32) {
    %c0_i32 = arith.constant 0 : i32
    %c0_i32_0 = arith.constant 0 : i32
    %c0_i32_1 = arith.constant 0 : i32
    return %arg0, %c0_i32, %c0_i32_0 : i32, i32, i32
  }
  func.func @transform_2(%arg0: i32) -> (i32, i32) {
    %c0_i32 = arith.constant 0 : i32
    %c0_i32_0 = arith.constant 0 : i32
    %c0_i32_1 = arith.constant 0 : i32
    return %c0_i32, %c0_i32_0 : i32, i32
  }
  func.func @transform_3(%arg0: i32) -> (i32, i32) {
    %c0_i32 = arith.constant 0 : i32
    %c0_i32_0 = arith.constant 0 : i32
    %c0_i32_1 = arith.constant 0 : i32
    return %c0_i32, %c0_i32_0 : i32, i32
  }
  func.func @transform_4(%arg0: i32) -> (i32, i32, i32) {
    %c0_i32 = arith.constant 0 : i32
    %c0_i32_0 = arith.constant 0 : i32
    %c0_i32_1 = arith.constant 0 : i32
    %c0_i32_2 = arith.constant 0 : i32
    return %c0_i32, %c0_i32_0, %c0_i32_1 : i32, i32, i32
  }
  func.func @transform_5(%arg0: i32) -> (i32, i32, i32) {
    %c0_i32 = arith.constant 0 : i32
    %c0_i32_0 = arith.constant 0 : i32
    %c0_i32_1 = arith.constant 0 : i32
    %c0_i32_2 = arith.constant 0 : i32
    return %c0_i32, %c0_i32_0, %c0_i32_1 : i32, i32, i32
  }
  func.func @transform_6(%arg0: i32) -> (i32, i32) {
    %c0_i32 = arith.constant 0 : i32
    %c0_i32_0 = arith.constant 0 : i32
    %c0_i32_1 = arith.constant 0 : i32
    return %c0_i32, %c0_i32_0 : i32, i32
  }
  func.func @transform_7(%arg0: i32) -> (i32, i32, i32) {
    %c0_i32 = arith.constant 0 : i32
    %c0_i32_0 = arith.constant 0 : i32
    %c0_i32_1 = arith.constant 0 : i32
    return %arg0, %c0_i32, %c0_i32_0 : i32, i32, i32
  }
}

</mosaic_0001>

<bundles_post_ra>
// kernel: tpu_custom_call.1
= control target key start
LH: loop header
LB: loop body
LE: loop exit
PB: predicated region body
PF: predicated region fallthrough
CT: control target
= control target key end

     0   :  { %12 = vsyncpa [#allocation5], 0  ;;  %s2173_s0 = inlined_call_operand.vmem [shape: s32[2,1,256], index: 0, kind: input, shape index: {}]   ;;  %s2174_s1 = inlined_call_operand.hbm [shape: f32[2,16,256], index: 1, kind: input, shape index: {}]   ;;  %s2175_s2 = inlined_call_operand.vmem [shape: f32[8,16], index: 2, kind: input, shape index: {}]   ;;  %s2176_s3 = inlined_call_operand.vmem [shape: f32[16,16], index: 3, kind: input, shape index: {}]   ;;  %s2177_s4 = inlined_call_operand.vmem [shape: f32[2,8,9], index: 4, kind: input, shape index: {}]   ;;  %s2178_s5 = inlined_call_operand.vmem [shape: f32[3,8,1], index: 5, kind: input, shape index: {}]   ;;  %s2179_s6 = inlined_call_operand.vmem [shape: f32[16,1], index: 6, kind: input, shape index: {}]   ;;  %s2180_s7 = inlined_call_operand.hbm [shape: f32[2,16,256], index: 7, kind: output, shape index: {}]  }
   0x1   :  { %13 = vsyncpa [#allocation6], 0  ;;  %s20_s26 = sshll.u32 %s2174_s1, 4  ;;  %s1215_s27 = smov [#allocation4]   ;;  %s21_s26 = int_to_ptr.hbm [resolvable:$true] %s20_s26 }
   0x2   :  { %s22_s28 = sshll.u32 %s1215_s27, 4  ;;  %s1216_s29 = smov 256   ;;  %s23_s28 = int_to_ptr.vmem [resolvable:$true] %s22_s28 }
   0x3   :  { %s1217_s30 = smov 16  }
   0x4   :  { %28 = dma.hbm_to_vmem [thread:$0]  %s21_s26, 1024, %s23_s28, [#allocation5], %s1216_s29, %s1216_s29, %s1217_s30  }
   0x5   :  { %1211 = dma.done.wait [#allocation5], 1024  }
   0x6   :  { %1212 = vsyncadd [#allocation5], 4294966272  ;;  %v1218_v0 = vmov 4   ;;  %v2188_v1 = vmov 0   ;;  %v1292_v2 = vld [vmem:[%s2177_s4] sm:$0xff]  ;;  %v61_v3 = vld [vmem:[#allocation4 + $0x10] sm:$0xff] }
   0x7   :  { %1105 = vset.pattern.permute.xlu0 %v1218_v0  ;;  %1106 = vset.pattern.permute.xlu1 %v2188_v1  ;;  %v62_v4 = vld [vmem:[#allocation4 + $0x18] sm:$0xff]  ;;  %v59_v5 = vld [vmem:[#allocation4] sm:$0xff]  ;;  %v60_v6 = vld [vmem:[#allocation4 + $0x8] sm:$0xff]  ;;  %vm2181_vm0 = vcmask 130048   ;;  %v1220_v13 = vmov 5   ;;  %v1221_v14 = vmov 3  }
   0x8   :  { %116 = vperm.xlu0 %1105, %v1292_v2   ;;  %86 = vmatpush.msra.mxu2 %v61_v3  ;;  %v43_v7 = vld [vmem:[%s2175_s2] sm:$0xff]  ;;  %v660_v8 = vld [vmem:[#allocation4 + $0x30] sm:$0xff]  ;;  %v661_v9 = vld [vmem:[#allocation4 + $0x38] sm:$0xff]  ;;  %v1222_v16 = vmov 8   ;;  %v1223_v18 = vmov 6   ;;  %v1224_v19 = vmov 2  }
   0x9   :  { %106 = vmatpush.msra.mxu3 %v62_v4  ;;  %676 = vmatpush.msra.mxu0 %v660_v8  ;;  %v658_v10 = vld [vmem:[#allocation4 + $0x20] sm:$0xff]  ;;  %v1055_v11 = vld [vmem:[%s2178_s5 + $0x8] sm:$0xff]  ;;  %v1056_v20 = vld [vmem:[%s2178_s5 + $0x10] sm:$0xff]  ;;  %v1225_v21 = vmov 7   ;;  %s1227_s17 = smov 4   ;;  %s1228_s18 = smov 1  }
   0xa   :  { %87 = vmatpush.msra.mxu2 %v59_v5  ;;  %v659_v12 = vld [vmem:[#allocation4 + $0x28] sm:$0xff]  ;;  %696 = vmatpush.msra.mxu1 %v661_v9  ;;  %v49_v17 = vld [vmem:[%s2178_s5] sm:$0xff]  ;;  %s1226_s5 = smov 127   ;;  %s1229_s19 = smov 2   ;;  %v1231_v43 = vmov 1  }
   0xb   :  { %107 = vmatpush.msra.mxu3 %v60_v6  ;;  %1058 = vmatmul.msk.f32.vlgmr.msra.gmra.mxu2 %vm2181_vm0, %v43_v7  ;;  %v1310_v15 = vld [vmem:[%s2177_s4 + $0x8] sm:$0xff]  ;;  %s1230_s20 = smov 126   ;;  %s1232_s21 = smov 125   ;;  %v1441_v63 = vld [vmem:[%s2173_s0] sm:$0x3] }
   0xc   :  { %1059 = vmatmul.msk.f32.vlgmr.msra.gmra.mxu3 %vm2181_vm0, %v43_v7  ;;  %677 = vmatpush.msra.mxu0 %v658_v10  ;;  %s1233_s22 = smov 3   ;;  %s1234_s23 = smov 124   ;;  %vm137_vm1 = vcmp.lt.s32.totalorder %v1441_v63, 15  ;;  %vm160_vm2 = vcmp.ge.s32.totalorder %v1441_v63, 1  ;;  %vm183_vm3 = vcmp.lt.s32.totalorder %v1441_v63, 14  ;;  %vm206_vm5 = vcmp.ge.s32.totalorder %v1441_v63, 2 }
   0xd   :  { %123 = vperm.xlu1 %1106, %v1055_v11   ;;  %697 = vmatpush.msra.mxu1 %v659_v12  ;;  %v138_v5 = vsel %vm137_vm1, 1, %v2188_v1  ;;  %v161_v8 = vsel %vm160_vm2, 1, %v2188_v1  ;;  %v184_v12 = vsel %vm183_vm3, 1, %v2188_v1  ;;  %vm229_vm6 = vcmp.lt.s32.totalorder %v1441_v63, 13  ;;  %s1235_s26 = smov 112   ;;  %s1236_s27 = smov 96  }
   0xe   :  { %1068 = vmatmul.msk.f32.vlgmr.msra.gmra.mxu0 %vm2181_vm0, %v43_v7  ;;  %1069 = vmatmul.msk.f32.vlgmr.msra.gmra.mxu1 %vm2181_vm0, %v43_v7  ;;  %v139_v7 = vperm.slane %v138_v5, 0  ;;  %v140_v9 = vperm.slane %v138_v5, 1  ;;  %v162_v10 = vperm.slane %v161_v8, 0  ;;  %v163_v11 = vperm.slane %v161_v8, 1  ;;  %s1237_s28 = smov 32   ;;  %s1238_s8 = smov 80  }
   0xf   :  { %1107 = vset.pattern.permute.xlu2 %v1220_v13  ;;  %vm252_vm10 = vcmp.ge.s32.totalorder %v1441_v63, 3  ;;  %vm275_vm2 = vcmp.lt.s32.totalorder %v1441_v63, 12  ;;  %s1239_s9 = smov 48   ;;  %s1240_s11 = smov 64  }
  0x10   :  { %1108 = vset.pattern.permute.xlu0 %v1221_v14  ;;  %146 = vperm.xlu2 %1107, %v1292_v2   ;;  %vm1460_vm7 = vcmp.eq.s32.totalorder %v139_v7, 1  ;;  %vm1469_vm8 = vcmp.eq.s32.totalorder %v140_v9, 1  ;;  %vm1482_vm11 = vcmp.eq.s32.totalorder %v162_v10, 1  ;;  %vm1486_vm12 = vcmp.eq.s32.totalorder %v163_v11, 1 }
  0x11   :  { %169 = vperm.xlu0 %1108, %v1292_v2  }
  0x15   :  { %1109 = vset.pattern.permute.xlu1 %v1223_v18 }
  0x16   :  { %192 = vperm.xlu1 %1109, %v1292_v2  }
  0x18   :  { %1112 = vset.pattern.permute.xlu2 %v1218_v0  ;;  %v132_v0 = vlaneseq }
  0x19   :  { %1110 = vset.pattern.permute.xlu0 %v1222_v16  ;;  %316 = vperm.xlu2 %1112, %v1310_v15  }
  0x1a   :  { %284 = vperm.xlu0 %1110, %v1292_v2   ;;  %v1448_v4 = vand.u32 127, %v132_v0 }
  0x1c   :  { %vm2183_vm4 = vcmp.lt.s32.totalorder %v1448_v4, 127  ;;  %vm2182_vm9 = vcmp.lt.s32.totalorder %v1448_v4, 1  ;;  %vm2184_vm13 = vcmp.lt.s32.totalorder %v1448_v4, 126  ;;  %vm2185_vm1 = vcmp.lt.s32.totalorder %v1448_v4, 2 }
  0x1e   :  { %1116 = vset.pattern.permute.xlu1 %v1221_v14 }
  0x1f   :  { %367 = vperm.xlu1 %1116, %v1310_v15  }
  0x21   :  { %1113 = vset.pattern.permute.xlu2 %v2188_v1 }
  0x22   :  { %1111 = vset.pattern.permute.xlu0 %v2188_v1  ;;  %323 = vperm.xlu2 %1113, %v1056_v20  }
  0x23   :  { %65 = vperm.xlu0 %1111, %v49_v17   ;;  %v207_v17 = vsel %vm206_vm5, 1, %v2188_v1 }
  0x27   :  { %1117 = vset.pattern.permute.xlu1 %v1223_v18 }
  0x28   :  { %390 = vperm.xlu1 %1117, %v1310_v15  }
  0x2b   :  { %307 = vperm.xlu0 %1111, %v1292_v2  }
  0x30   :  { %1121 = vset.pattern.permute.xlu1 %v2188_v1 }
  0x33   :  { %1114 = vset.pattern.permute.xlu0 %v1220_v13 }
  0x34   :  { %344 = vperm.xlu0 %1114, %v1310_v15  }
  0x3c   :  { %1115 = vset.pattern.permute.xlu0 %v1224_v19 }
  0x3d   :  { %215 = vperm.xlu0 %1115, %v1292_v2  }
  0x45   :  { %413 = vperm.xlu0 %1115, %v1310_v15  }
  0x4d   :  { %1118 = vset.pattern.permute.xlu0 %v1225_v21 }
  0x4e   :  { %238 = vperm.xlu0 %1118, %v1292_v2  }
  0x6a   :  { %v1388_v44 = vpop.permute.xlu2 %146 }
  0x73   :  { %v1394_v45 = vpop.permute.xlu2 %316 }
  0x7a   :  { %v117_v22 = vpop.permute.xlu0 %116 }
  0x7c   :  { %v1401_v46 = vpop.permute.xlu2 %323 }
  0x7f   :  { %v124_v34 = vpop.permute.xlu1 %123 }
  0x83   :  { %v1332_v23 = vpop.permute.xlu0 %169 }
  0x88   :  { %v1404_v47 = vpop.permute.xlu1 %192 }
  0x8b   :  { %v679_v25 = vpop.f32.mrf.mxu0  ;;  %v699_v26 = vpop.f32.mrf.mxu1 }
  0x8c   :  { %v1334_v24 = vpop.permute.xlu0 %284 }
  0x8e   :  { %v89_v27 = vpop.f32.mrf.mxu2 }
  0x8f   :  { %v109_v28 = vpop.f32.mrf.mxu3 }
  0x91   :  { %v1410_v50 = vpop.permute.xlu1 %367 }
  0x95   :  { %v66_v29 = vpop.permute.xlu0 %65 }
  0x96   :  { %v1336_v30 = vadd.f32 %v89_v27, %v66_v29  ;;  %v1338_v31 = vadd.f32 %v109_v28, %v66_v29  ;;  %v1340_v32 = vadd.f32 %v679_v25, %v66_v29  ;;  %v1342_v33 = vadd.f32 %v699_v26, %v66_v29 }
  0x97   :  { %v186_v25 = vperm.slane %v184_v12, 1  ;;  %v230_v26 = vsel %vm229_vm6, 1, %v2188_v1  ;;  %vm2186_vm6 = vcmp.lt.s32.totalorder %v1448_v4, 125 }
  0x98   :  { %2197 = vst [vmem:[#allocation10_spill] sm:$0xff] %v1340_v32  ;;  %710 = vrot.lane.b32.xlu2 %v1342_v33, %s1226_s5  ;;  %792 = vrot.lane.b32.xlu0 %v1340_v32, %s1227_s17  ;;  %v119_v35 = vmul.f32 %v117_v22, %v1336_v30  ;;  %v120_v36 = vmul.f32 %v117_v22, %v1338_v31 }
  0x99   :  { %2198 = vst [vmem:[#allocation11_spill] sm:$0xff] %v1342_v33  ;;  %v704_v37 = vmul.f32 %v1340_v32, %v117_v22  ;;  %708 = vrot.lane.b32.xlu1 %v1340_v32, %s1226_s5  ;;  %v705_v38 = vmul.f32 %v1342_v33, %v117_v22  ;;  %v185_v22 = vperm.slane %v184_v12, 0  ;;  %vm1503_vm15 = vcmp.eq.s32.totalorder %v186_v25, 1 }
  0x9a   :  { %v1354_v39 = vadd.f32 %v124_v34, %v119_v35  ;;  %v1356_v40 = vadd.f32 %v124_v34, %v120_v36  ;;  %v1418_v53 = vpop.permute.xlu1 %390 }
  0x9b   :  { %v1358_v41 = vadd.f32 %v704_v37, %v124_v34  ;;  %v1360_v42 = vadd.f32 %v705_v38, %v124_v34  ;;  %v208_v34 = vperm.slane %v207_v17, 0  ;;  %v209_v37 = vperm.slane %v207_v17, 1 }
  0x9c   :  { %v253_v38 = vsel %vm252_vm10, 1, %v2188_v1  ;;  %vm1499_vm14 = vcmp.eq.s32.totalorder %v185_v22, 1 }
  0x9d   :  { %v1406_v48 = vpop.permute.xlu0 %307  ;;  %vm1514_vm3 = vcmp.eq.s32.totalorder %v208_v34, 1  ;;  %vm1518_vm5 = vcmp.eq.s32.totalorder %v209_v37, 1  ;;  %v255_v12 = vperm.slane %v253_v38, 1 }
  0xa0   :  { %722 = vrot.lane.b32.xlu2 %v1342_v33, %s1228_s18  ;;  %201 = vrot.lane.b32.xlu0 %v1338_v31, %s1229_s19 }
  0xa1   :  { %720 = vrot.lane.b32.xlu1 %v1340_v32, %s1228_s18 }
  0xa6   :  { %v1412_v51 = vpop.permute.xlu0 %344 }
  0xa8   :  { %734 = vrot.lane.b32.xlu2 %v1342_v33, %s1230_s20  ;;  %436 = vperm.xlu0 %1118, %v1310_v15  }
  0xa9   :  { %732 = vrot.lane.b32.xlu1 %v1340_v32, %s1230_s20 }
  0xaf   :  { %v1420_v54 = vpop.permute.xlu0 %215 }
  0xb0   :  { %746 = vrot.lane.b32.xlu2 %v1342_v33, %s1229_s19  ;;  %1119 = vset.pattern.permute.xlu0 %v1231_v43 }
  0xb1   :  { %744 = vrot.lane.b32.xlu1 %v1340_v32, %s1229_s19  ;;  %261 = vperm.xlu0 %1119, %v1292_v2  }
  0xb7   :  { %v1428_v57 = vpop.permute.xlu0 %413 }
  0xb8   :  { %758 = vrot.lane.b32.xlu2 %v1342_v33, %s1232_s21 }
  0xb9   :  { %756 = vrot.lane.b32.xlu1 %v1340_v32, %s1232_s21  ;;  %459 = vperm.xlu0 %1119, %v1310_v15  }
  0xc0   :  { %770 = vrot.lane.b32.xlu2 %v1342_v33, %s1233_s22  ;;  %v1432_v60 = vpop.permute.xlu0 %238 }
  0xc1   :  { %768 = vrot.lane.b32.xlu1 %v1340_v32, %s1233_s22  ;;  %1120 = vset.pattern.permute.xlu0 %v1222_v16 }
  0xc8   :  { %782 = vrot.lane.b32.xlu2 %v1342_v33, %s1234_s23 }
  0xc9   :  { %780 = vrot.lane.b32.xlu1 %v1340_v32, %s1234_s23 }
  0xd0   :  { %130 = vrot.lane.b32.xlu2 %v1338_v31, %s1226_s5 }
  0xd1   :  { %794 = vrot.lane.b32.xlu1 %v1342_v33, %s1227_s17 }
  0xd8   :  { %155 = vrot.lane.b32.xlu2 %v1338_v31, %s1228_s18 }
  0xd9   :  { %128 = vrot.lane.b32.xlu1 %v1336_v30, %s1226_s5 }
  0xe0   :  { %178 = vrot.lane.b32.xlu2 %v1338_v31, %s1230_s20 }
  0xe1   :  { %153 = vrot.lane.b32.xlu1 %v1336_v30, %s1228_s18  ;;  %s1041_s18 = sshll.u32 %s2180_s7, 4  ;;  %s1042_s18 = int_to_ptr.hbm [resolvable:$true] %s1041_s18 }
  0xe8   :  { %199 = vrot.lane.b32.xlu2 %v1336_v30, %s1229_s19 }
  0xe9   :  { %176 = vrot.lane.b32.xlu1 %v1336_v30, %s1230_s20 }
  0xf0   :  { %224 = vrot.lane.b32.xlu2 %v1338_v31, %s1232_s21 }
  0xf1   :  { %222 = vrot.lane.b32.xlu1 %v1336_v30, %s1232_s21 }
  0xf2   :  { %v711_v49 = vpop.permute.xlu2 %710 }
  0xf8   :  { %247 = vrot.lane.b32.xlu2 %v1338_v31, %s1233_s22 }
  0xf9   :  { %245 = vrot.lane.b32.xlu1 %v1336_v30, %s1233_s22 }
  0xfa   :  { %v723_v52 = vpop.permute.xlu2 %722 }
 0x100   :  { %270 = vrot.lane.b32.xlu2 %v1338_v31, %s1234_s23 }
 0x101   :  { %268 = vrot.lane.b32.xlu1 %v1336_v30, %s1234_s23 }
 0x102   :  { %v1422_v55 = vpop.permute.xlu2 %734 }
 0x108   :  { %293 = vrot.lane.b32.xlu2 %v1338_v31, %s1227_s17 }
 0x109   :  { %291 = vrot.lane.b32.xlu1 %v1336_v30, %s1227_s17 }
 0x10a   :  { %v1430_v58 = vpop.permute.xlu2 %746  ;;  %v1443_v2 = vpop.permute.xlu0 %792 }
 0x10b   :  { %v709_v56 = vpop.permute.xlu1 %708 }
 0x10c   :  { %v712_v14 = vsel %vm2183_vm4, %v709_v56, %v711_v49  ;;  %v713_v19 = vsel %vm2183_vm4, %v711_v49, %v709_v56  ;;  %v231_v49 = vperm.slane %v230_v26, 0  ;;  %v232_v56 = vperm.slane %v230_v26, 1 }
 0x10d   :  { %v714_v27 = vsel %vm1460_vm7, %v712_v14, 0.0  ;;  %v715_v35 = vsel %vm1469_vm8, %v713_v19, 0.0 }
 0x10e   :  { %v716_v0 = vmul.f32 %v714_v27, %v1388_v44  ;;  %v717_v8 = vmul.f32 %v715_v35, %v1388_v44  ;;  %vm1527_vm10 = vcmp.eq.s32.totalorder %v231_v49, 1  ;;  %vm1531_vm0 = vcmp.eq.s32.totalorder %v232_v56, 1 }
 0x10f   :  { %v276_v35 = vsel %vm275_vm2, 1, %v2188_v1  ;;  %vm1563_vm2 = vcmp.eq.s32.totalorder %v255_v12, 1 }
 0x110   :  { %v718_v26 = vadd.f32 %v716_v0, %v1358_v41  ;;  %v277_v56 = vperm.slane %v276_v35, 0  ;;  %v278_v0 = vperm.slane %v276_v35, 1  ;;  %v2225_v35 = vmov 0 }
 0x112   :  { %v1434_v61 = vpop.permute.xlu2 %758  ;;  %v1466_v16 = vpop.permute.xlu0 %201 }
 0x113   :  { %v721_v59 = vpop.permute.xlu1 %720 }
 0x114   :  { %v725_v36 = vsel %vm2182_vm9, %v723_v52, %v721_v59  ;;  %v724_v43 = vsel %vm2182_vm9, %v721_v59, %v723_v52  ;;  %v254_v59 = vperm.slane %v253_v38, 0  ;;  %vm2187_vm9 = vcmp.lt.s32.totalorder %v1448_v4, 3 }
 0x115   :  { %v726_v52 = vsel %vm1482_vm11, %v725_v36, 0.0  ;;  %v727_v9 = vsel %vm1486_vm12, %v724_v43, 0.0  ;;  %v719_v36 = vadd.f32 %v717_v8, %v1360_v42 }
 0x116   :  { %v728_v27 = vmul.f32 %v726_v52, %v1332_v23  ;;  %v729_v37 = vmul.f32 %v727_v9, %v1332_v23  ;;  %vm1549_vm4 = vcmp.eq.s32.totalorder %v254_v59, 1 }
 0x118   :  { %v730_v8 = vadd.f32 %v728_v27, %v718_v26 }
 0x11a   :  { %v1446_v3 = vpop.permute.xlu2 %770  ;;  %v1535_v22 = vpop.permute.xlu0 %436 }
 0x11b   :  { %v1436_v62 = vpop.permute.xlu1 %732 }
 0x11c   :  { %v736_v14 = vsel %vm2184_vm13, %v1436_v62, %v1422_v55  ;;  %v737_v34 = vsel %vm2184_vm13, %v1422_v55, %v1436_v62  ;;  %v2221_v62 = vmov 0  ;;  %vm298_vm13 = vcmp.ge.s32.totalorder %v1441_v63, 4 }
 0x11d   :  { %v738_v41 = vsel %vm1499_vm14, %v736_v14, 0.0  ;;  %v2222_v62 = vsel %vm1563_vm2, 4294967295, %v2221_v62  ;;  %v739_v49 = vsel %vm1503_vm15, %v737_v34, 0.0 }
 0x11e   :  { %v740_v59 = vmul.f32 %v738_v41, %v1404_v47  ;;  %v741_v12 = vmul.f32 %v739_v49, %v1404_v47 }
 0x122   :  { %v1476_v20 = vpop.permute.xlu2 %782 }
 0x123   :  { %v1452_v6 = vpop.permute.xlu1 %744  ;;  %v1614_v49 = vpop.permute.xlu0 %261 }
 0x124   :  { %v748_v55 = vsel %vm2185_vm1, %v1452_v6, %v1430_v58  ;;  %v749_v42 = vsel %vm2185_vm1, %v1430_v58, %v1452_v6  ;;  %v731_v6 = vadd.f32 %v729_v37, %v719_v36  ;;  %vm1598_vm1 = vcmp.eq.s32.totalorder %v278_v0, 1 }
 0x125   :  { %v750_v9 = vsel %vm1514_vm3, %v749_v42, 0.0  ;;  %v751_v63 = vsel %vm1518_vm5, %v748_v55, 0.0  ;;  %v2226_v35 = vsel %vm1598_vm1, 4294967295, %v2225_v35 }
 0x126   :  { %v752_v37 = vmul.f32 %v750_v9, %v1420_v54 }
 0x12a   :  { %v1546_v38 = vpop.permute.xlu2 %130 }
 0x12b   :  { %v757_v21 = vpop.permute.xlu1 %756 }
 0x12c   :  { %v760_v52 = vsel %vm2186_vm6, %v757_v21, %v1434_v61  ;;  %v761_v58 = vsel %vm2186_vm6, %v1434_v61, %v757_v21  ;;  %v299_v21 = vsel %vm298_vm13, 1, %v2188_v1  ;;  %vm1594_vm6 = vcmp.eq.s32.totalorder %v277_v56, 1 }
 0x12d   :  { %v762_v26 = vsel %vm1527_vm10, %v760_v52, 0.0  ;;  %v763_v27 = vsel %vm1531_vm0, %v761_v58, 0.0  ;;  %vm2227_vm13 = vcmp.lt.s32.totalorder %v1448_v4, 124  ;;  %v300_v56 = vperm.slane %v299_v21, 0 }
 0x12e   :  { %v301_v0 = vperm.slane %v299_v21, 1  ;;  %v742_v52 = vadd.f32 %v740_v59, %v730_v8  ;;  %v743_v58 = vadd.f32 %v741_v12, %v731_v6  ;;  %v764_v9 = vmul.f32 %v762_v26, %v1432_v60 }
 0x12f   :  { %v2229_v8 = vmov 0  ;;  %v2231_v6 = vmov 0 }
 0x132   :  { %v156_v1 = vpop.permute.xlu2 %155 }
 0x133   :  { %v769_v25 = vpop.permute.xlu1 %768 }
 0x134   :  { %v772_v14 = vsel %vm2187_vm9, %v769_v25, %v1446_v3  ;;  %v773_v61 = vsel %vm2187_vm9, %v1446_v3, %v769_v25  ;;  %v753_v3 = vmul.f32 %v751_v63, %v1420_v54  ;;  %vm2228_vm9 = vmmov %vm2227_vm13  ;;  %v765_v63 = vmul.f32 %v763_v27, %v1432_v60 }
 0x135   :  { %v774_v55 = vsel %vm1549_vm4, %v773_v61, 0.0  ;;  %v775_v42 = vsel %vm1563_vm2, %v772_v14, 0.0  ;;  %vm1629_vm2 = vcmp.eq.s32.totalorder %v301_v0, 1 }
 0x136   :  { %v755_v33 = vadd.f32 %v753_v3, %v743_v58  ;;  %v776_v14 = vmul.f32 %v774_v55, %v1614_v49  ;;  %v777_v32 = vmul.f32 %v775_v42, %v1614_v49  ;;  %v2232_v6 = vsel %vm1629_vm2, 4294967295, %v2231_v6 }
 0x138   :  { %v767_v12 = vadd.f32 %v765_v63, %v755_v33 }
 0x13a   :  { %v779_v3 = vadd.f32 %v777_v32, %v767_v12 }
 0x13b   :  { %v781_v36 = vpop.permute.xlu1 %780 }
 0x13c   :  { %v784_v25 = vsel %vm2227_vm13, %v781_v36, %v1476_v20  ;;  %v785_v41 = vsel %vm2228_vm9, %v1476_v20, %v781_v36  ;;  %v754_v36 = vadd.f32 %v752_v37, %v742_v52  ;;  %vm2193_vm9 = vcmp.lt.s32.totalorder %v1448_v4, 4 }
 0x13d   :  { %v786_v20 = vsel %vm1594_vm6, %v784_v25, 0.0  ;;  %v787_v61 = vsel %vm1598_vm1, %v785_v41, 0.0  ;;  %vm1625_vm13 = vcmp.eq.s32.totalorder %v300_v56, 1 }
 0x13e   :  { %v2230_v8 = vsel %vm1625_vm13, 4294967295, %v2229_v8  ;;  %v766_v59 = vadd.f32 %v764_v9, %v754_v36  ;;  %v788_v21 = vmul.f32 %v786_v20, %v1334_v24  ;;  %v789_v26 = vmul.f32 %v787_v61, %v1334_v24  ;;  %v179_v9 = vpop.permute.xlu2 %178 }
 0x140   :  { %v778_v37 = vadd.f32 %v776_v14, %v766_v59  ;;  %v791_v56 = vadd.f32 %v789_v26, %v779_v3 }
 0x142   :  { %v790_v42 = vadd.f32 %v788_v21, %v778_v37 }
 0x143   :  { %v795_v27 = vpop.permute.xlu1 %794 }
 0x144   :  { %v796_v25 = vsel %vm2193_vm9, %v1443_v2, %v795_v27  ;;  %v797_v41 = vsel %vm2193_vm9, %v795_v27, %v1443_v2  ;;  %vm2233_vm9 = vcmp.lt.s32.totalorder %v1448_v4, 127 }
 0x145   :  { %v798_v55 = vsel %vm1625_vm13, %v797_v41, 0.0  ;;  %v799_v33 = vsel %vm1629_vm2, %v796_v25, 0.0  ;;  %vm2234_vm2 = vmmov %vm2233_vm9  ;;  %vm2235_vm13 = vcmp.lt.s32.totalorder %v1448_v4, 1 }
 0x146   :  { %v800_v0 = vmul.f32 %v798_v55, %v1406_v48  ;;  %v801_v32 = vmul.f32 %v799_v33, %v1406_v48  ;;  %v200_v61 = vpop.permute.xlu2 %199  ;;  %vm2236_vm1 = vmmov %vm2235_vm13 }
 0x148   :  { %v1647_v52 = vadd.f32 %v800_v0, %v790_v42  ;;  %v1649_v58 = vadd.f32 %v801_v32, %v791_v56 }
 0x14a   :  { %810 = vrot.lane.b32.xlu2 %v1649_v58, %s1235_s26  ;;  %808 = vrot.lane.b32.xlu1 %v1647_v52, %s1235_s26 }
 0x14b   :  { %v129_v2 = vpop.permute.xlu1 %128 }
 0x14c   :  { %v135_v63 = vsel %vm2233_vm9, %v129_v2, %v1546_v38  ;;  %v136_v20 = vsel %vm2234_vm2, %v1546_v38, %v129_v2  ;;  %vm2237_vm2 = vcmp.lt.s32.totalorder %v1448_v4, 2  ;;  %vm2247_vm9 = vnez %v2222_v62 }
 0x14d   :  { %v143_v12 = vsel %vm1460_vm7, %v135_v63, 0.0  ;;  %v144_v38 = vsel %vm1469_vm8, %v136_v20, 0.0  ;;  %vm2238_vm7 = vmmov %vm2237_vm2  ;;  %vm2239_vm8 = vcmp.lt.s32.totalorder %v1448_v4, 126 }
 0x14e   :  { %v149_v27 = vmul.f32 %v1388_v44, %v143_v12  ;;  %v150_v37 = vmul.f32 %v1388_v44, %v144_v38  ;;  %v205_v13 = vsel %vm2238_vm7, %v1466_v16, %v200_v61  ;;  %v225_v55 = vpop.permute.xlu2 %224 }
 0x150   :  { %v151_v29 = vadd.f32 %v149_v27, %v1354_v39  ;;  %v152_v3 = vadd.f32 %v150_v37, %v1356_v40 }
 0x152   :  { %822 = vrot.lane.b32.xlu2 %v1649_v58, %s1217_s30  ;;  %820 = vrot.lane.b32.xlu1 %v1647_v52, %s1217_s30 }
 0x153   :  { %v154_v36 = vpop.permute.xlu1 %153 }
 0x154   :  { %v158_v14 = vsel %vm2235_vm13, %v154_v36, %v156_v1  ;;  %v159_v59 = vsel %vm2236_vm1, %v156_v1, %v154_v36  ;;  %v204_v1 = vsel %vm2237_vm2, %v200_v61, %v1466_v16  ;;  %vm2252_vm13 = vnez %v2232_v6 }
 0x155   :  { %v166_v21 = vsel %vm1482_vm11, %v159_v59, 0.0  ;;  %v167_v26 = vsel %vm1486_vm12, %v158_v14, 0.0  ;;  %vm2240_vm11 = vmmov %vm2239_vm8  ;;  %v213_v41 = vsel %vm1518_vm5, %v204_v1, 0.0  ;;  %vm2241_vm12 = vcmp.lt.s32.totalorder %v1448_v4, 125 }
 0x156   :  { %v172_v18 = vmul.f32 %v1332_v23, %v166_v21  ;;  %v173_v28 = vmul.f32 %v1332_v23, %v167_v26  ;;  %v212_v23 = vsel %vm1514_vm3, %v205_v13, 0.0  ;;  %v219_v10 = vmul.f32 %v1420_v54, %v213_v41  ;;  %v248_v63 = vpop.permute.xlu2 %247 }
 0x157   :  { %v218_v32 = vmul.f32 %v1420_v54, %v212_v23  ;;  %vm2245_vm3 = vcmp.lt.s32.totalorder %v1448_v4, 124 }
 0x158   :  { %v174_v40 = vadd.f32 %v172_v18, %v151_v29  ;;  %v175_v42 = vadd.f32 %v173_v28, %v152_v3  ;;  %vm2246_vm5 = vmmov %vm2245_vm3 }
 0x15a   :  { %834 = vrot.lane.b32.xlu2 %v1649_v58, %s1236_s27  ;;  %832 = vrot.lane.b32.xlu1 %v1647_v52, %s1236_s27 }
 0x15b   :  { %v177_v44 = vpop.permute.xlu1 %176 }
 0x15c   :  { %v181_v25 = vsel %vm2239_vm8, %v177_v44, %v179_v9  ;;  %v182_v16 = vsel %vm2240_vm11, %v179_v9, %v177_v44  ;;  %vm332_vm8 = vcmp.lt.s32.totalorder %v1448_v4, 112 }
 0x15d   :  { %v189_v33 = vsel %vm1499_vm14, %v181_v25, 0.0  ;;  %v190_v39 = vsel %vm1503_vm15, %v182_v16, 0.0  ;;  %vm2242_vm14 = vmmov %vm2241_vm12  ;;  %vm2243_vm15 = vcmp.lt.s32.totalorder %v1448_v4, 3 }
 0x15e   :  { %v195_v56 = vmul.f32 %v1404_v47, %v189_v33  ;;  %v196_v0 = vmul.f32 %v1404_v47, %v190_v39  ;;  %v271_v61 = vpop.permute.xlu2 %270  ;;  %vm2244_vm1 = vmmov %vm2243_vm15 }
 0x160   :  { %v197_v9 = vadd.f32 %v195_v56, %v174_v40  ;;  %v198_v11 = vadd.f32 %v196_v0, %v175_v42 }
 0x162   :  { %846 = vrot.lane.b32.xlu2 %v1649_v58, %s1237_s28  ;;  %844 = vrot.lane.b32.xlu1 %v1647_v52, %s1237_s28  ;;  %v221_v5 = vadd.f32 %v219_v10, %v198_v11  ;;  %v220_v7 = vadd.f32 %v218_v32, %v197_v9 }
 0x163   :  { %v223_v2 = vpop.permute.xlu1 %222 }
 0x164   :  { %v227_v47 = vsel %vm2241_vm12, %v223_v2, %v225_v55  ;;  %v228_v54 = vsel %vm2242_vm14, %v225_v55, %v223_v2  ;;  %v55_v2 = vld [vmem:[%s2179_s6 + $0x8] sm:$0xff] }
 0x165   :  { %v235_v59 = vsel %vm1527_vm10, %v227_v47, 0.0  ;;  %v236_v12 = vsel %vm1531_vm0, %v228_v54, 0.0  ;;  %vm2248_vm0 = vnez %v2226_v35  ;;  %vm2251_vm10 = vnez %v2230_v8  ;;  %v1786_v8 = vld [vmem:[%s2173_s0 + $0x2] sm:$0x3] }
 0x166   :  { %v241_v1 = vmul.f32 %v1432_v60, %v235_v59  ;;  %v242_v17 = vmul.f32 %v1432_v60, %v236_v12  ;;  %v294_v3 = vpop.permute.xlu2 %293  ;;  %vm335_vm2 = vcmp.lt.s32.totalorder %v1786_v8, 15  ;;  %vm358_vm7 = vcmp.ge.s32.totalorder %v1786_v8, 1 }
 0x167   :  { %vm381_vm14 = vcmp.lt.s32.totalorder %v1786_v8, 14 }
 0x168   :  { %v243_v44 = vadd.f32 %v241_v1, %v220_v7  ;;  %v244_v43 = vadd.f32 %v242_v17, %v221_v5 }
 0x16b   :  { %v246_v20 = vpop.permute.xlu1 %245 }
 0x16c   :  { %v250_v36 = vsel %vm2243_vm15, %v246_v20, %v248_v63  ;;  %v251_v14 = vsel %vm2244_vm1, %v248_v63, %v246_v20  ;;  %vm355_vm15 = vcmp.lt.s32.totalorder %v1448_v4, 16 }
 0x16d   :  { %v258_v27 = vsel %vm1549_vm4, %v251_v14, 0.0  ;;  %v259_v37 = vsel %vm2247_vm9, %v250_v36, 0.0  ;;  %vm2249_vm4 = vcmp.lt.s32.totalorder %v1448_v4, 4  ;;  %v805_v36 = vmul.f32 %v1649_v58, %v1394_v45 }
 0x16e   :  { %v264_v18 = vmul.f32 %v1614_v49, %v258_v27  ;;  %v265_v28 = vmul.f32 %v1614_v49, %v259_v37  ;;  %vm378_vm9 = vcmp.lt.s32.totalorder %v1448_v4, 96 }
 0x170   :  { %v266_v16 = vadd.f32 %v264_v18, %v243_v44  ;;  %v267_v60 = vadd.f32 %v265_v28, %v244_v43 }
 0x173   :  { %v269_v38 = vpop.permute.xlu1 %268 }
 0x174   :  { %v273_v21 = vsel %vm2245_vm3, %v269_v38, %v271_v61  ;;  %v274_v26 = vsel %vm2246_vm5, %v271_v61, %v269_v38  ;;  %v804_v61 = vmul.f32 %v1647_v52, %v1394_v45  ;;  %vm404_vm5 = vcmp.ge.s32.totalorder %v1786_v8, 2 }
 0x175   :  { %v281_v19 = vsel %vm1594_vm6, %v273_v21, 0.0  ;;  %v282_v13 = vsel %vm2248_vm0, %v274_v26, 0.0  ;;  %vm2250_vm6 = vmmov %vm2249_vm4  ;;  %v807_v26 = vadd.f32 %v805_v36, %v1401_v46 }
 0x176   :  { %v287_v29 = vmul.f32 %v1334_v24, %v281_v19  ;;  %v288_v62 = vmul.f32 %v1334_v24, %v282_v13 }
 0x178   :  { %v289_v41 = vadd.f32 %v287_v29, %v266_v16  ;;  %v290_v55 = vadd.f32 %v288_v62, %v267_v60 }
 0x17b   :  { %v292_v25 = vpop.permute.xlu1 %291 }
 0x17c   :  { %v296_v34 = vsel %vm2249_vm4, %v292_v25, %v294_v3  ;;  %v297_v35 = vsel %vm2250_vm6, %v294_v3, %v292_v25  ;;  %vm401_vm6 = vcmp.lt.s32.totalorder %v1448_v4, 32 }
 0x17d   :  { %v304_v23 = vsel %vm2251_vm10, %v297_v35, 0.0  ;;  %v305_v49 = vsel %vm2252_vm13, %v296_v34, 0.0 }
 0x17e   :  { %v310_v24 = vmul.f32 %v1406_v48, %v304_v23  ;;  %v311_v33 = vmul.f32 %v1406_v48, %v305_v49  ;;  %v2253_v48 = vmov 0  }
 0x17f   :  { %v336_v6 = vsel %vm335_vm2, 1, %v2253_v48  ;;  %v359_v0 = vsel %vm358_vm7, 1, %v2253_v48  ;;  %v405_v34 = vsel %vm404_vm5, 1, %v2253_v48  ;;  %vm427_vm2 = vcmp.lt.s32.totalorder %v1786_v8, 13 }
 0x180   :  { %v1753_v39 = vadd.f32 %v310_v24, %v289_v41  ;;  %v1755_v40 = vadd.f32 %v311_v33, %v290_v55  ;;  %v337_v42 = vperm.slane %v336_v6, 0  ;;  %v338_v56 = vperm.slane %v336_v6, 1 }
 0x181   :  { %v360_v7 = vperm.slane %v359_v0, 0  ;;  %v361_v63 = vperm.slane %v359_v0, 1  ;;  %v406_v33 = vperm.slane %v405_v34, 0  ;;  %vm450_vm7 = vcmp.ge.s32.totalorder %v1786_v8, 3 }
 0x182   :  { %353 = vrot.lane.b32.xlu2 %v1755_v40, %s1217_s30  ;;  %330 = vrot.lane.b32.xlu1 %v1755_v40, %s1235_s26  ;;  %vm1797_vm11 = vcmp.eq.s32.totalorder %v337_v42, 1  ;;  %vm1801_vm12 = vcmp.eq.s32.totalorder %v338_v56, 1 }
 0x183   :  { %328 = vrot.lane.b32.xlu0 %v1753_v39, %s1235_s26  ;;  %vm1823_vm1 = vcmp.eq.s32.totalorder %v360_v7, 1  ;;  %vm1829_vm3 = vcmp.eq.s32.totalorder %v361_v63, 1  ;;  %vm1868_vm10 = vcmp.eq.s32.totalorder %v406_v33, 1 }
 0x18a   :  { %374 = vrot.lane.b32.xlu2 %v1753_v39, %s1236_s27  ;;  %351 = vrot.lane.b32.xlu1 %v1753_v39, %s1217_s30 }
 0x18b   :  { %376 = vrot.lane.b32.xlu0 %v1755_v40, %s1236_s27 }
 0x192   :  { %397 = vrot.lane.b32.xlu2 %v1753_v39, %s1237_s28  ;;  %856 = vrot.lane.b32.xlu1 %v1647_v52, %s1238_s8 }
 0x193   :  { %399 = vrot.lane.b32.xlu0 %v1755_v40, %s1237_s28 }
 0x19a   :  { %858 = vrot.lane.b32.xlu2 %v1649_v58, %s1238_s8  ;;  %498 = vperm.xlu1 %1121, %v1310_v15  }
 0x19b   :  { %482 = vperm.xlu0 %1120, %v1310_v15  }
 0x1a2   :  { %868 = vrot.lane.b32.xlu2 %v1647_v52, %s1239_s9  ;;  %420 = vrot.lane.b32.xlu1 %v1753_v39, %s1238_s8 }
 0x1a3   :  { %870 = vrot.lane.b32.xlu0 %v1649_v58, %s1239_s9 }
 0x1a4   :  { %1122 = vset.pattern.permute.xlu0 %v2253_v48  ;;  %v811_v15 = vpop.permute.xlu2 %810 }
 0x1aa   :  { %422 = vrot.lane.b32.xlu2 %v1755_v40, %s1238_s8  ;;  %443 = vrot.lane.b32.xlu1 %v1753_v39, %s1239_s9 }
 0x1ac   :  { %v823_v20 = vpop.permute.xlu2 %822 }
 0x1b2   :  { %445 = vrot.lane.b32.xlu2 %v1755_v40, %s1239_s9  ;;  %466 = vrot.lane.b32.xlu1 %v1753_v39, %s1240_s11 }
 0x1b4   :  { %v835_v3 = vpop.permute.xlu2 %834 }
 0x1ba   :  { %468 = vrot.lane.b32.xlu2 %v1755_v40, %s1240_s11  ;;  %880 = vrot.lane.b32.xlu1 %v1647_v52, %s1240_s11  ;;  %v382_v52 = vsel %vm381_vm14, 1, %v2253_v48 }
 0x1bb   :  { %v383_v19 = vperm.slane %v382_v52, 0  ;;  %v384_v13 = vperm.slane %v382_v52, 1 }
 0x1bc   :  { %v809_v32 = vpop.permute.xlu1 %808 }
 0x1bd   :  { %v812_v11 = vsel %vm332_vm8, %v809_v32, %v811_v15  ;;  %v813_v5 = vsel %vm332_vm8, %v811_v15, %v809_v32  ;;  %vm1848_vm0 = vcmp.eq.s32.totalorder %v383_v19, 1  ;;  %vm1852_vm4 = vcmp.eq.s32.totalorder %v384_v13, 1  ;;  %v847_v32 = vpop.permute.xlu2 %846 }
 0x1be   :  { %v814_v47 = vsel %vm1797_vm11, %v812_v11, 0.0  ;;  %v815_v54 = vsel %vm1801_vm12, %v813_v5, 0.0  ;;  %v407_v15 = vperm.slane %v405_v34, 1 }
 0x1bf   :  { %v816_v59 = vmul.f32 %v814_v47, %v1412_v51  ;;  %v817_v12 = vmul.f32 %v815_v54, %v1412_v51 }
 0x1c0   :  { %vm1872_vm13 = vcmp.eq.s32.totalorder %v407_v15, 1 }
 0x1c1   :  { %v819_v28 = vadd.f32 %v817_v12, %v807_v26  ;;  %v1890_v12 = vpop.permute.xlu0 %459 }
 0x1c2   :  { %882 = vrot.lane.b32.xlu2 %v1649_v58, %s1240_s11  ;;  %518 = vperm.xlu1 %1121, %v55_v2   ;;  %v806_v58 = vadd.f32 %v804_v61, %v1401_v46 }
 0x1c4   :  { %v821_v21 = vpop.permute.xlu1 %820  ;;  %v818_v18 = vadd.f32 %v816_v59, %v806_v58 }
 0x1c5   :  { %v824_v27 = vsel %vm355_vm15, %v821_v21, %v823_v20  ;;  %v825_v37 = vsel %vm355_vm15, %v823_v20, %v821_v21 }
 0x1c6   :  { %v826_v1 = vsel %vm1823_vm1, %v825_v37, 0.0  ;;  %v827_v17 = vsel %vm1829_vm3, %v824_v27, 0.0 }
 0x1c7   :  { %v828_v44 = vmul.f32 %v826_v1, %v1410_v50  ;;  %v829_v43 = vmul.f32 %v827_v17, %v1410_v50 }
 0x1c9   :  { %v830_v29 = vadd.f32 %v828_v44, %v818_v18  ;;  %v831_v62 = vadd.f32 %v829_v43, %v819_v28  ;;  %v320_v28 = vmul.f32 %v1394_v45, %v1755_v40  ;;  %v428_v43 = vsel %vm427_vm2, 1, %v2253_v48 }
 0x1cc   :  { %v833_v60 = vpop.permute.xlu1 %832 }
 0x1cd   :  { %v836_v35 = vsel %vm378_vm9, %v833_v60, %v835_v3  ;;  %v837_v23 = vsel %vm378_vm9, %v835_v3, %v833_v60  ;;  %v451_v60 = vsel %vm450_vm7, 1, %v2253_v48 }
 0x1ce   :  { %v838_v49 = vsel %vm1848_vm0, %v836_v35, 0.0  ;;  %v839_v41 = vsel %vm1852_vm4, %v837_v23, 0.0  ;;  %v429_v35 = vperm.slane %v428_v43, 0  ;;  %v327_v23 = vadd.f32 %v1401_v46, %v320_v28 }
 0x1cf   :  { %v840_v55 = vmul.f32 %v838_v49, %v1418_v53  ;;  %v841_v24 = vmul.f32 %v839_v41, %v1418_v53  ;;  %v452_v33 = vperm.slane %v451_v60, 0 }
 0x1d1   :  { %v842_v6 = vadd.f32 %v840_v55, %v830_v29  ;;  %v843_v42 = vadd.f32 %v841_v24, %v831_v62  ;;  %v319_v29 = vmul.f32 %v1394_v45, %v1753_v39  ;;  %v430_v39 = vperm.slane %v428_v43, 1 }
 0x1d3   :  { %v326_v49 = vadd.f32 %v1401_v46, %v319_v29  ;;  %vm1943_vm14 = vcmp.eq.s32.totalorder %v430_v39, 1 }
 0x1d4   :  { %v845_v11 = vpop.permute.xlu1 %844 }
 0x1d5   :  { %v848_v5 = vsel %vm401_vm6, %v845_v11, %v847_v32  ;;  %v849_v7 = vsel %vm401_vm6, %v847_v32, %v845_v11 }
 0x1d6   :  { %v850_v2 = vsel %vm1868_vm10, %v849_v7, 0.0  ;;  %v851_v63 = vsel %vm1872_vm13, %v848_v5, 0.0 }
 0x1d7   :  { %v852_v20 = vmul.f32 %v850_v2, %v1428_v57  ;;  %v853_v47 = vmul.f32 %v851_v63, %v1428_v57 }
 0x1d9   :  { %v1886_v54 = vadd.f32 %v852_v20, %v842_v6  ;;  %v1888_v61 = vadd.f32 %v853_v47, %v843_v42  ;;  %v453_v42 = vperm.slane %v451_v60, 1 }
 0x1db   :  { %vm1962_vm5 = vcmp.eq.s32.totalorder %v453_v42, 1 }
 0x1dc   :  { %v354_v36 = vpop.permute.xlu2 %353 }
 0x1e4   :  { %v375_v59 = vpop.permute.xlu2 %374 }
 0x1ec   :  { %v398_v52 = vpop.permute.xlu2 %397 }
 0x1f4   :  { %v331_v21 = vpop.permute.xlu1 %330  ;;  %v1892_v26 = vpop.permute.xlu2 %858 }
 0x1f5   :  { %v329_v58 = vpop.permute.xlu0 %328 }
 0x1f6   :  { %v333_v44 = vsel %vm332_vm8, %v329_v58, %v331_v21  ;;  %v334_v62 = vsel %vm332_vm8, %v331_v21, %v329_v58  ;;  %vm424_vm8 = vcmp.lt.s32.totalorder %v1448_v4, 80 }
 0x1f7   :  { %v341_v34 = vsel %vm1797_vm11, %v333_v44, 0.0  ;;  %v342_v45 = vsel %vm1801_vm12, %v334_v62, 0.0  ;;  %vm1935_vm11 = vcmp.eq.s32.totalorder %v429_v35, 1  ;;  %vm473_vm12 = vcmp.lt.s32.totalorder %v1786_v8, 12 }
 0x1f8   :  { %v347_v15 = vmul.f32 %v1412_v51, %v341_v34  ;;  %v348_v46 = vmul.f32 %v1412_v51, %v342_v45 }
 0x1fa   :  { %v349_v25 = vadd.f32 %v347_v15, %v326_v49 }
 0x1fc   :  { %v352_v27 = vpop.permute.xlu1 %351  ;;  %v1894_v1 = vpop.permute.xlu2 %868 }
 0x1fd   :  { %v377_v37 = vpop.permute.xlu0 %376  ;;  %v357_v3 = vsel %vm355_vm15, %v354_v36, %v352_v27  ;;  %v356_v40 = vsel %vm355_vm15, %v352_v27, %v354_v36  ;;  %vm489_vm15 = vcmp.ge.s32.totalorder %v1786_v8, 4  ;;  %v474_v8 = vsel %vm473_vm12, 1, %v2253_v48 }
 0x1fe   :  { %v364_v41 = vsel %vm1823_vm1, %v357_v3, 0.0  ;;  %v379_v55 = vsel %vm378_vm9, %v375_v59, %v377_v37  ;;  %v365_v6 = vsel %vm1829_vm3, %v356_v40, 0.0  ;;  %v380_v9 = vsel %vm378_vm9, %v377_v37, %v375_v59 }
 0x1ff   :  { %v370_v32 = vmul.f32 %v1410_v50, %v364_v41  ;;  %v387_v38 = vsel %vm1848_vm0, %v379_v55, 0.0  ;;  %v371_v51 = vmul.f32 %v1410_v50, %v365_v6  ;;  %v388_v5 = vsel %vm1852_vm4, %v380_v9, 0.0 }
 0x200   :  { %vm447_vm1 = vcmp.lt.s32.totalorder %v1448_v4, 48  ;;  %vm1952_vm3 = vcmp.eq.s32.totalorder %v452_v33, 1  ;;  %v350_v50 = vadd.f32 %v348_v46, %v327_v23  ;;  %v393_v16 = vmul.f32 %v1418_v53, %v387_v38 }
 0x201   :  { %v490_v36 = vsel %vm489_vm15, 1, %v2253_v48  ;;  %v372_v59 = vadd.f32 %v370_v32, %v349_v25  ;;  %v394_v21 = vmul.f32 %v1418_v53, %v388_v5  ;;  %v475_v44 = vperm.slane %v474_v8, 0 }
 0x202   :  { %v373_v27 = vadd.f32 %v371_v51, %v350_v50  ;;  %v476_v43 = vperm.slane %v474_v8, 1  ;;  %v491_v29 = vperm.slane %v490_v36, 0  ;;  %v492_v3 = vperm.slane %v490_v36, 1 }
 0x203   :  { %v395_v60 = vadd.f32 %v393_v16, %v372_v59  ;;  %vm470_vm9 = vcmp.lt.s32.totalorder %v1448_v4, 64  ;;  %vm2009_vm0 = vcmp.eq.s32.totalorder %v475_v44, 1 }
 0x204   :  { %v1896_v17 = vpop.permute.xlu1 %856  ;;  %v423_v18 = vpop.permute.xlu2 %422  ;;  %v396_v35 = vadd.f32 %v394_v21, %v373_v27  ;;  %vm2013_vm4 = vcmp.eq.s32.totalorder %v476_v43, 1 }
 0x205   :  { %v400_v19 = vpop.permute.xlu0 %399  ;;  %v861_v23 = vsel %vm424_vm8, %v1892_v26, %v1896_v17 }
 0x206   :  { %v402_v63 = vsel %vm401_vm6, %v398_v52, %v400_v19  ;;  %v403_v20 = vsel %vm401_vm6, %v400_v19, %v398_v52  ;;  %vm2017_vm6 = vcmp.eq.s32.totalorder %v491_v29, 1  ;;  %v863_v32 = vsel %vm1943_vm14, %v861_v23, 0.0 }
 0x207   :  { %v410_v37 = vsel %vm1868_vm10, %v403_v20, 0.0  ;;  %v411_v19 = vsel %vm1872_vm13, %v402_v63, 0.0  ;;  %vm2021_vm10 = vcmp.eq.s32.totalorder %v492_v3, 1  ;;  %vm2286_vm13 = vcmask 130048  }
 0x208   :  { %v416_v34 = vmul.f32 %v1428_v57, %v410_v37  ;;  %v417_v40 = vmul.f32 %v1428_v57, %v411_v19  ;;  %vm2287_vm2 = vmmov %vm2286_vm13 }
 0x209   :  { %vm2290_vm7 = vmmov %vm2287_vm2 }
 0x20a   :  { %v418_v9 = vadd.f32 %v416_v34, %v395_v60  ;;  %v419_v46 = vadd.f32 %v417_v40, %v396_v35  ;;  %vm2293_vm12 = vmmov %vm2287_vm2 }
 0x20b   :  { %vm2295_vm15 = vmmov %vm2287_vm2 }
 0x20c   :  { %v1899_v13 = vpop.permute.xlu1 %498  ;;  %v446_v7 = vpop.permute.xlu2 %445 }
 0x20d   :  { %v1926_v10 = vpop.permute.xlu0 %482 }
 0x214   :  { %v421_v24 = vpop.permute.xlu1 %420 }
 0x215   :  { %v425_v58 = vsel %vm424_vm8, %v421_v24, %v423_v18  ;;  %v426_v52 = vsel %vm424_vm8, %v423_v18, %v421_v24  ;;  %v860_v18 = vsel %vm424_vm8, %v1896_v17, %v1892_v26  ;;  %v871_v62 = vpop.permute.xlu0 %870  ;;  %v54_v26 = vld [vmem:[%s2179_s6] sm:$0xff]  ;;  %v469_v17 = vpop.permute.xlu2 %468  ;;  %vm2291_vm8 = vmmov %vm2287_vm2 }
 0x216   :  { %v433_v56 = vsel %vm1935_vm11, %v425_v58, 0.0  ;;  %v434_v0 = vsel %vm1943_vm14, %v426_v52, 0.0  ;;  %v862_v49 = vsel %vm1935_vm11, %v860_v18, 0.0  ;;  %v873_v55 = vsel %vm447_vm1, %v871_v62, %v1894_v1  ;;  %513 = vperm.xlu0 %1122, %v54_v26   ;;  %vm2292_vm11 = vmmov %vm2287_vm2 }
 0x217   :  { %v439_v41 = vmul.f32 %v1535_v22, %v433_v56  ;;  %v440_v57 = vmul.f32 %v1535_v22, %v434_v0  ;;  %v864_v38 = vmul.f32 %v862_v49, %v1535_v22  ;;  %v872_v51 = vsel %vm447_vm1, %v1894_v1, %v871_v62  ;;  %vm2294_vm14 = vmmov %vm2287_vm2 }
 0x218   :  { %v874_v5 = vsel %vm1952_vm3, %v873_v55, 0.0  ;;  %v865_v58 = vmul.f32 %v863_v32, %v1535_v22  ;;  %v875_v52 = vsel %vm1962_vm5, %v872_v51, 0.0 }
 0x219   :  { %v441_v25 = vadd.f32 %v439_v41, %v418_v9  ;;  %v442_v63 = vadd.f32 %v440_v57, %v419_v46  ;;  %v876_v27 = vmul.f32 %v874_v5, %v1890_v12 }
 0x21a   :  { %v867_v18 = vadd.f32 %v865_v58, %v1888_v61 }
 0x21c   :  { %v444_v28 = vpop.permute.xlu1 %443 }
 0x21d   :  { %v448_v48 = vsel %vm447_vm1, %v444_v28, %v446_v7  ;;  %v449_v53 = vsel %vm447_vm1, %v446_v7, %v444_v28  ;;  %v883_v22 = vpop.permute.xlu2 %882 }
 0x21e   :  { %v456_v45 = vsel %vm1952_vm3, %v449_v53, 0.0  ;;  %v457_v39 = vsel %vm1962_vm5, %v448_v48, 0.0  ;;  %v866_v48 = vadd.f32 %v864_v38, %v1886_v54  ;;  %v877_v53 = vmul.f32 %v875_v52, %v1890_v12  ;;  %v44_v54 = vld [vmem:[%s2176_s3] sm:$0xff] }
 0x21f   :  { %v462_v14 = vmul.f32 %v1890_v12, %v456_v45  ;;  %v463_v42 = vmul.f32 %v1890_v12, %v457_v39 }
 0x220   :  { %v878_v62 = vadd.f32 %v876_v27, %v866_v48  ;;  %v879_v40 = vadd.f32 %v877_v53, %v867_v18 }
 0x221   :  { %v464_v59 = vadd.f32 %v462_v14, %v441_v25  ;;  %v465_v21 = vadd.f32 %v463_v42, %v442_v63 }
 0x224   :  { %v467_v7 = vpop.permute.xlu1 %466 }
 0x225   :  { %v471_v20 = vsel %vm470_vm9, %v467_v7, %v469_v17  ;;  %v472_v8 = vsel %vm470_vm9, %v469_v17, %v467_v7 }
 0x226   :  { %v479_v11 = vsel %vm2009_vm0, %v471_v20, 0.0  ;;  %v480_v50 = vsel %vm2013_vm4, %v472_v8, 0.0  ;;  %v495_v1 = vsel %vm2017_vm6, %v472_v8, 0.0  ;;  %v496_v2 = vsel %vm2021_vm10, %v471_v20, 0.0 }
 0x227   :  { %v485_v16 = vmul.f32 %v1926_v10, %v479_v11  ;;  %v486_v36 = vmul.f32 %v1926_v10, %v480_v50  ;;  %v501_v19 = vmul.f32 %v1899_v13, %v495_v1  ;;  %v502_v44 = vmul.f32 %v1899_v13, %v496_v2 }
 0x229   :  { %v487_v37 = vadd.f32 %v485_v16, %v464_v59  ;;  %v488_v28 = vadd.f32 %v486_v36, %v465_v21 }
 0x22b   :  { %v503_v43 = vadd.f32 %v501_v19, %v487_v37  ;;  %v504_v29 = vadd.f32 %v502_v44, %v488_v28 }
 0x22c   :  { %v881_v56 = vpop.permute.xlu1 %880 }
 0x22d   :  { %v884_v47 = vsel %vm470_vm9, %v881_v56, %v883_v22  ;;  %v885_v0 = vsel %vm470_vm9, %v883_v22, %v881_v56  ;;  %541 = vmatpush.msrb.mxu2 %v503_v43  ;;  %564 = vmatpush.msrb.mxu3 %v504_v29 }
 0x22e   :  { %v886_v12 = vsel %vm2009_vm0, %v884_v47, 0.0  ;;  %v887_v61 = vsel %vm2013_vm4, %v885_v0, 0.0  ;;  %v892_v3 = vsel %vm2017_vm6, %v885_v0, 0.0  ;;  %v893_v4 = vsel %vm2021_vm10, %v884_v47, 0.0 }
 0x22f   :  { %v888_v60 = vmul.f32 %v886_v12, %v1926_v10  ;;  %v889_v34 = vmul.f32 %v887_v61, %v1926_v10  ;;  %542 = vmatpush.msrb.mxu2 %v1336_v30  ;;  %565 = vmatpush.msrb.mxu3 %v1338_v31  ;;  %v894_v23 = vmul.f32 %v892_v3, %v1899_v13  ;;  %v45_v30 = vld [vmem:[%s2176_s3 + $0x8] sm:$0xff]  ;;  %v2288_v31 = vld [vmem:[#allocation10_spill] sm:$0xff]  ;;  %s1241_s3 = smov [#allocation7]  }
 0x230   :  { %1060 = vmatmul.msk.f32.vlgmr.msrb.gmra.mxu2 %vm2286_vm13, %v44_v54  ;;  %1062 = vmatmul.msk.f32.vlgmr.msrb.gmra.mxu3 %vm2287_vm2, %v44_v54  ;;  %v895_v39 = vmul.f32 %v893_v4, %v1899_v13  ;;  %v2289_v10 = vld [vmem:[#allocation11_spill] sm:$0xff]  ;;  %s1039_s16 = sshll.u32 %s1241_s3, 4  ;;  %s1040_s16 = int_to_ptr.vmem [resolvable:$true] %s1039_s16 }
 0x231   :  { %v890_v35 = vadd.f32 %v888_v60, %v878_v62  ;;  %v891_v45 = vadd.f32 %v889_v34, %v879_v40 }
 0x233   :  { %v896_v49 = vadd.f32 %v894_v23, %v890_v35  ;;  %v897_v41 = vadd.f32 %v895_v39, %v891_v45 }
 0x234   :  { %v519_v32 = vpop.permute.xlu1 %518 }
 0x235   :  { %918 = vmatpush.msrb.mxu0 %v896_v49  ;;  %941 = vmatpush.msrb.mxu1 %v897_v41 }
 0x237   :  { %919 = vmatpush.msrb.mxu0 %v2288_v31  ;;  %942 = vmatpush.msrb.mxu1 %v2289_v10 }
 0x238   :  { %1061 = vmatmul.msk.f32.gmra.mxu2 %vm2290_vm7, %v45_v30  ;;  %1063 = vmatmul.msk.f32.gmra.mxu3 %vm2291_vm8, %v45_v30 }
 0x239   :  { %1070 = vmatmul.msk.f32.vlgmr.msrb.gmra.mxu0 %vm2292_vm11, %v44_v54  ;;  %1072 = vmatmul.msk.f32.vlgmr.msrb.gmra.mxu1 %vm2293_vm12, %v44_v54 }
 0x241   :  { %1071 = vmatmul.msk.f32.gmra.mxu0 %vm2294_vm14, %v45_v30  ;;  %1073 = vmatmul.msk.f32.gmra.mxu1 %vm2295_vm15, %v45_v30 }
 0x288   :  { %v514_v13 = vpop.permute.xlu0 %513 }
 0x2b3   :  { %v567_v57 = vpop.f32.mrf.mxu3  ;;  %v544_v55 = vpop.f32.mrf.mxu2 }
 0x2b4   :  { %v568_v26 = vadd.f32 %v567_v57, %v514_v13  ;;  %v545_v17 = vadd.f32 %v544_v55, %v514_v13 }
 0x2b6   :  { %v1065_v24 = vmul.f32 -1.442695, %v568_v26  ;;  %v1064_v33 = vmul.f32 -1.442695, %v545_v17  ;;  %v921_v15 = vpop.f32.mrf.mxu0  ;;  %v944_v6 = vpop.f32.mrf.mxu1 }
 0x2b7   :  { %v922_v9 = vadd.f32 %v921_v15, %v514_v13  ;;  %v945_v46 = vadd.f32 %v944_v6, %v514_v13 }
 0x2b8   :  { %1123 = vpow2.f32 %v1065_v24 }
 0x2b9   :  { %1125 = vpow2.f32 %v1064_v33  ;;  %v1074_v14 = vmul.f32 -1.442695, %v922_v9  ;;  %v1075_v42 = vmul.f32 -1.442695, %v945_v46 }
 0x2bb   :  { %1127 = vpow2.f32 %v1074_v14  ;;  %v547_v38 = vpop.f32.mrf.mxu2  ;;  %v570_v51 = vpop.f32.mrf.mxu3 }
 0x2bc   :  { %1129 = vpow2.f32 %v1075_v42  ;;  %v548_v5 = vadd.f32 %v547_v38, %v519_v32  ;;  %v571_v7 = vadd.f32 %v570_v51, %v519_v32  ;;  %v1155_v51 = vld [vmem:[#allocation4 + $0x8] sm:$0xff] }
 0x2be   :  { %v1124_v25 = vpop.eup %1123  ;;  %v1066_v63 = vmul.f32 -1.442695, %v548_v5  ;;  %v924_v11 = vpop.f32.mrf.mxu0  ;;  %v1067_v1 = vmul.f32 -1.442695, %v571_v7 }
 0x2bf   :  { %v1126_v20 = vpop.eup %1125  ;;  %v586_v8 = vadd.f32 1.0, %v1124_v25  ;;  %v925_v36 = vadd.f32 %v924_v11, %v519_v32  ;;  %v947_v27 = vpop.f32.mrf.mxu1 }
 0x2c0   :  { %v2092_v50 = vadd.f32 1.0, %v1126_v20  ;;  %1131 = vpow2.f32 %v1066_v63  ;;  %v948_v43 = vadd.f32 %v947_v27, %v519_v32  ;;  %v1156_v20 = vld [vmem:[#allocation4] sm:$0xff] }
 0x2c1   :  { %v1128_v2 = vpop.eup %1127  ;;  %1133 = vrcp.f32 %v586_v8  ;;  %v613_v58 = vand.u32 2147483647, %v586_v8  ;;  %v615_v52 = vand.u32 2147483648, %v586_v8  ;;  %v1076_v44 = vmul.f32 -1.442695, %v925_v36  ;;  %v1157_v27 = vld [vmem:[#allocation4 + $0x20] sm:$0xff] }
 0x2c2   :  { %v1130_v16 = vpop.eup %1129  ;;  %1135 = vrcp.f32 %v2092_v50  ;;  %v2095_v59 = vadd.f32 1.0, %v1128_v2  ;;  %v598_v37 = vand.u32 2147483647, %v2092_v50  ;;  %v600_v28 = vand.u32 2147483648, %v2092_v50 }
 0x2c3   :  { %v2097_v21 = vadd.f32 1.0, %v1130_v16  ;;  %1137 = vpow2.f32 %v1067_v1  ;;  %vm609_vm1 = vweird.f32 %v586_v8  ;;  %vm594_vm3 = vweird.f32 %v2092_v50 }
 0x2c4   :  { %1139 = vrcp.f32 %v2095_v59  ;;  %vm2106_vm5 = vcmp.eq.f32.partialorder %v613_v58, 8.507059e+37  ;;  %v616_v56 = vor.u32 1.1754944e-38, %v615_v52  ;;  %v975_v47 = vand.u32 2147483647, %v2095_v59 }
 0x2c5   :  { %1141 = vrcp.f32 %v2097_v21  ;;  %v977_v0 = vand.u32 2147483648, %v2095_v59  ;;  %vm2113_vm9 = vcmp.eq.f32.partialorder %v598_v37, 8.507059e+37  ;;  %v990_v12 = vand.u32 2147483647, %v2097_v21 }
 0x2c6   :  { %v1132_v19 = vpop.eup %1131  ;;  %v601_v4 = vor.u32 1.1754944e-38, %v600_v28  ;;  %v992_v60 = vand.u32 2147483648, %v2097_v21  ;;  %vm971_vm0 = vweird.f32 %v2095_v59  ;;  %vm986_vm4 = vweird.f32 %v2097_v21 }
 0x2c7   :  { %v1134_v48 = vpop.eup %1133  ;;  %v2104_v53 = vadd.f32 1.0, %v1132_v19  ;;  %vm2125_vm10 = vcmp.eq.f32.partialorder %v975_v47, 8.507059e+37  ;;  %v978_v41 = vor.u32 1.1754944e-38, %v977_v0  ;;  %vm2130_vm2 = vcmp.eq.f32.partialorder %v990_v12, 8.507059e+37  ;;  %v1159_v0 = vld [vmem:[#allocation4 + $0x10] sm:$0xff] }
 0x2c8   :  { %v1136_v29 = vpop.eup %1135  ;;  %v605_v18 = vmul.f32 %v1134_v48, %v586_v8  ;;  %vm610_vm6 = vweird.f32 %v1134_v48  ;;  %v993_v55 = vor.u32 1.1754944e-38, %v992_v60  ;;  %v1077_v15 = vmul.f32 -1.442695, %v948_v43 }
 0x2c9   :  { %v590_v54 = vmul.f32 %v1136_v29, %v2092_v50  ;;  %1143 = vrcp.f32 %v2104_v53  ;;  %v1138_v61 = vpop.eup %1137  ;;  %vm595_vm13 = vweird.f32 %v1136_v29  ;;  %vm611_vm7 = vmor %vm609_vm1, %vm610_vm6  ;;  %v628_v33 = vand.u32 2147483647, %v2104_v53 }
 0x2ca   :  { %v606_v3 = vsub.f32 1.0, %v605_v18  ;;  %1145 = vpow2.f32 %v1076_v44  ;;  %v1140_v34 = vpop.eup %1139  ;;  %v2122_v35 = vadd.f32 1.0, %v1138_v61  ;;  %vm596_vm8 = vmor %vm594_vm3, %vm595_vm13  ;;  %v630_v50 = vand.u32 2147483648, %v2104_v53 }
 0x2cb   :  { %v591_v40 = vsub.f32 1.0, %v590_v54  ;;  %v1142_v23 = vpop.eup %1141  ;;  %v967_v39 = vmul.f32 %v1140_v34, %v2095_v59  ;;  %vm972_vm11 = vweird.f32 %v1140_v34  ;;  %vm624_vm3 = vweird.f32 %v2104_v53 }
 0x2cc   :  { %v607_v45 = vmul.f32 %v1134_v48, %v606_v3  ;;  %v982_v31 = vmul.f32 %v1142_v23, %v2097_v21  ;;  %1147 = vrcp.f32 %v2122_v35  ;;  %vm987_vm12 = vweird.f32 %v1142_v23  ;;  %vm973_vm14 = vmor %vm971_vm0, %vm972_vm11  ;;  %v1158_v21 = vld [vmem:[#allocation4 + $0x28] sm:$0xff] }
 0x2cd   :  { %v592_v30 = vmul.f32 %v1136_v29, %v591_v40  ;;  %v968_v57 = vsub.f32 1.0, %v967_v39  ;;  %vm988_vm15 = vmor %vm986_vm4, %vm987_vm12  ;;  %1149 = vpow2.f32 %v1077_v15  ;;  %vm639_vm4 = vweird.f32 %v2122_v35  ;;  %v1160_v40 = vld [vmem:[#allocation4 + $0x18] sm:$0xff] }
 0x2ce   :  { %v608_v13 = vadd.f32 %v1134_v48, %v607_v45  ;;  %v983_v24 = vsub.f32 1.0, %v982_v31 }
 0x2cf   :  { %v1144_v26 = vpop.eup %1143  ;;  %v593_v17 = vadd.f32 %v1136_v29, %v592_v30  ;;  %v969_v46 = vmul.f32 %v1140_v34, %v968_v57 }
 0x2d0   :  { %v1146_v6 = vpop.eup %1145  ;;  %v612_v9 = vsel %vm611_vm7, %v1134_v48, %v608_v13  ;;  %v620_v14 = vmul.f32 %v1144_v26, %v2104_v53  ;;  %v984_v38 = vmul.f32 %v1142_v23, %v983_v24  ;;  %vm625_vm1 = vweird.f32 %v1144_v26 }
 0x2d1   :  { %v617_v42 = vsel %vm2106_vm5, %v616_v56, %v612_v9  ;;  %v597_v32 = vsel %vm596_vm8, %v1136_v29, %v593_v17  ;;  %v970_v25 = vadd.f32 %v1140_v34, %v969_v46  ;;  %v2148_v1 = vadd.f32 1.0, %v1146_v6  ;;  %vm626_vm5 = vmor %vm624_vm3, %vm625_vm1 }
 0x2d2   :  { %v650_v5 = vmul.f32 %v1155_v51, %v617_v42  ;;  %v602_v7 = vsel %vm2113_vm9, %v601_v4, %v597_v32  ;;  %v621_v63 = vsub.f32 1.0, %v620_v14  ;;  %v985_v11 = vadd.f32 %v1142_v23, %v984_v38  ;;  %v1148_v2 = vpop.eup %1147  ;;  %v1162_v42 = vld [vmem:[#allocation4 + $0x38] sm:$0xff] }
 0x2d3   :  { %v649_v8 = vmul.f32 %v1156_v20, %v602_v7  ;;  %v974_v16 = vsel %vm973_vm14, %v1140_v34, %v970_v25  ;;  %v635_v52 = vmul.f32 %v1148_v2, %v2122_v35  ;;  %1151 = vrcp.f32 %v2148_v1  ;;  %v1150_v47 = vpop.eup %1149 }
 0x2d4   :  { %654 = vst [vmem:[#allocation7 + $0x8] sm:$0xff] %v650_v5  ;;  %v622_v36 = vmul.f32 %v1144_v26, %v621_v63  ;;  %v979_v59 = vsel %vm2125_vm10, %v978_v41, %v974_v16  ;;  %v989_v58 = vsel %vm988_vm15, %v1142_v23, %v985_v11  ;;  %v631_v48 = vor.u32 1.1754944e-38, %v630_v50 }
 0x2d5   :  { %653 = vst [vmem:[#allocation7] sm:$0xff] %v649_v8  ;;  %v1026_v37 = vmul.f32 %v1157_v27, %v979_v59  ;;  %v994_v19 = vsel %vm2130_vm2, %v993_v55, %v989_v58  ;;  %v636_v43 = vsub.f32 1.0, %v635_v52  ;;  %vm629_vm9 = vcmp.eq.f32.partialorder %v628_v33, 8.507059e+37 }
 0x2d6   :  { %v623_v28 = vadd.f32 %v1144_v26, %v622_v36  ;;  %v1027_v44 = vmul.f32 %v1158_v21, %v994_v19  ;;  %v645_v53 = vand.u32 2147483648, %v2122_v35  ;;  %vm640_vm0 = vweird.f32 %v1148_v2 }
 0x2d7   :  { %1031 = vst [vmem:[#allocation7 + $0x20] sm:$0xff] %v1026_v37  ;;  %v637_v22 = vmul.f32 %v1148_v2, %v636_v43  ;;  %v643_v56 = vand.u32 2147483647, %v2122_v35  ;;  %v965_v12 = vadd.f32 1.0, %v1150_v47  ;;  %vm641_vm6 = vmor %vm639_vm4, %vm640_vm0  ;;  %v1007_v39 = vand.u32 2147483648, %v2148_v1 }
 0x2d8   :  { %v627_v29 = vsel %vm626_vm5, %v1144_v26, %v623_v28  ;;  %1032 = vst [vmem:[#allocation7 + $0x28] sm:$0xff] %v1027_v44  ;;  %v646_v3 = vor.u32 1.1754944e-38, %v645_v53  ;;  %v1005_v35 = vand.u32 2147483647, %v2148_v1  ;;  %vm1001_vm2 = vweird.f32 %v2148_v1  ;;  %v1161_v26 = vld [vmem:[#allocation4 + $0x30] sm:$0xff] }
 0x2d9   :  { %v632_v18 = vsel %vm629_vm9, %v631_v48, %v627_v29  ;;  %v638_v62 = vadd.f32 %v1148_v2, %v637_v22  ;;  %v1152_v61 = vpop.eup %1151  ;;  %vm644_vm10 = vcmp.eq.f32.partialorder %v643_v56, 8.507059e+37  ;;  %1153 = vrcp.f32 %v965_v12 }
 0x2da   :  { %v651_v54 = vmul.f32 %v1159_v0, %v632_v18  ;;  %v997_v60 = vmul.f32 %v1152_v61, %v2148_v1  ;;  %vm1002_vm13 = vweird.f32 %v1152_v61  ;;  %v1008_v31 = vor.u32 1.1754944e-38, %v1007_v39 }
 0x2db   :  { %v642_v4 = vsel %vm641_vm6, %v1148_v2, %v638_v62  ;;  %vm1003_vm7 = vmor %vm1001_vm2, %vm1002_vm13  ;;  %vm1006_vm8 = vcmp.eq.f32.partialorder %v1005_v35, 8.507059e+37  ;;  %v1022_v24 = vand.u32 2147483648, %v965_v12  ;;  %v1020_v15 = vand.u32 2147483647, %v965_v12 }
 0x2dc   :  { %655 = vst [vmem:[#allocation7 + $0x10] sm:$0xff] %v651_v54  ;;  %v647_v34 = vsel %vm644_vm10, %v646_v3, %v642_v4  ;;  %v998_v45 = vsub.f32 1.0, %v997_v60  ;;  %vm1016_vm12 = vweird.f32 %v965_v12 }
 0x2dd   :  { %v652_v23 = vmul.f32 %v1160_v40, %v647_v34  ;;  %v1023_v9 = vor.u32 1.1754944e-38, %v1022_v24  ;;  %vm1021_vm15 = vcmp.eq.f32.partialorder %v1020_v15, 8.507059e+37 }
 0x2de   :  { %v999_v49 = vmul.f32 %v1152_v61, %v998_v45 }
 0x2df   :  { %656 = vst [vmem:[#allocation7 + $0x18] sm:$0xff] %v652_v23  ;;  %v1154_v41 = vpop.eup %1153 }
 0x2e0   :  { %v1000_v30 = vadd.f32 %v1152_v61, %v999_v49  ;;  %v1012_v10 = vmul.f32 %v1154_v41, %v965_v12  ;;  %vm1017_vm11 = vweird.f32 %v1154_v41 }
 0x2e1   :  { %vm1018_vm14 = vmor %vm1016_vm12, %vm1017_vm11 }
 0x2e2   :  { %v1004_v13 = vsel %vm1003_vm7, %v1152_v61, %v1000_v30  ;;  %v1013_v55 = vsub.f32 1.0, %v1012_v10 }
 0x2e3   :  { %v1009_v57 = vsel %vm1006_vm8, %v1008_v31, %v1004_v13 }
 0x2e4   :  { %v1028_v17 = vmul.f32 %v1161_v26, %v1009_v57  ;;  %v1014_v33 = vmul.f32 %v1154_v41, %v1013_v55 }
 0x2e6   :  { %1033 = vst [vmem:[#allocation7 + $0x30] sm:$0xff] %v1028_v17  ;;  %v1015_v6 = vadd.f32 %v1154_v41, %v1014_v33 }
 0x2e8   :  { %v1019_v46 = vsel %vm1018_vm14, %v1154_v41, %v1015_v6 }
 0x2e9   :  { %v1024_v14 = vsel %vm1021_vm15, %v1023_v9, %v1019_v46 }
 0x2ea   :  { %v1029_v32 = vmul.f32 %v1162_v42, %v1024_v14 }
 0x2ec   :  { %1034 = vst [vmem:[#allocation7 + $0x38] sm:$0xff] %v1029_v32 }
 0x2ed   :  { %1047 = dma.vmem_to_hbm [thread:$0]  %s1040_s16, 1024, %s1042_s18, [#allocation6], %s1216_s29, %s1216_s29, %s1217_s30  }
 0x2ee   :  { %1213 = dma.done.wait [#allocation6], 1024  }
 0x2ef   :  { %1214 = vsyncadd [#allocation6], 4294966272 }
 0x2f0   :  { %1052 = vsyncpa [#allocation5], 1 }
 0x2f1   :  { %1053 = vsyncpa [#allocation6], 1 }

</bundles_post_ra>
